<compile_context>
chip_gen: v7x
topology: tpu7x:2x2x1
jax: 0.10.0
libtpu: 0.0.40
codegen_flags: <defaults>
</compile_context>

<pallas_src>
from typing import NamedTuple

import numpy as np
import jax
import jax.numpy as jnp
from jax import lax
from jax.experimental import pallas as pl
from jax.experimental.pallas import tpu as pltpu


BN_EPS = 1e-3


# ----------------------------- helpers (glue, plain JAX) -----------------------------

def equalize_tensors(a, b):
    """Equalize leading (minibatch) dims of a and b (JAX port of swyft helper)."""
    n, m = a.shape[0], b.shape[0]
    if n == m:
        return a, b
    elif n == 1:
        return jnp.broadcast_to(a, (m,) + a.shape[1:]), b
    elif m == 1:
        return a, jnp.broadcast_to(b, (n,) + b.shape[1:])
    elif n < m:
        assert m % n == 0, "Cannot equalize tensors with non-divisible batch sizes."
        return jnp.tile(a, (m // n,) + (1,) * (a.ndim - 1)), b
    else:
        assert n % m == 0, "Cannot equalize tensors with non-divisible batch sizes."
        return a, jnp.tile(b, (n // m,) + (1,) * (b.ndim - 1))


class LogRatioSamples(NamedTuple):
    logratios: jnp.ndarray   # (batch, num_params)
    params: jnp.ndarray      # (batch, num_params, 1)
    parnames: np.ndarray     # (num_params, 1) of str
    metadata: dict


def _tpu_defaults():
    """(lane_target, vmem_cap) per chip generation; conservative if detection fails."""
    lane_target, vmem_cap = 256, 48 * 1024 * 1024          # valid everywhere (v7x-safe)
    try:
        kind = jax.devices()[0].device_kind.lower()
    except Exception:
        kind = ""
    if "v4" in kind or "v5" in kind:
        lane_target = 128                                   # 128x128 MXU tiles: K=128 native
    if kind and "v7" not in kind:
        vmem_cap = 96 * 1024 * 1024                         # v5e/v6e: 128 MiB physical VMEM
    return lane_target, vmem_cap


# ----------------------------------- Pallas kernel -----------------------------------

def lre_1dim_kernel(u_ref, w_in_ref, b_in_ref,
                    blk_w_ref, blk_b_ref, bn_scale_ref, bn_shift_ref,
                    w_out_ref, b_out_ref, out_ref):
    """One grid step = one channel block (Pc packed marginals) x one batch tile."""
    mm = w_in_ref.dtype                                 # matmul operand dtype (bf16 or f32)

    # Initial LinearWithChannel on the fused [features | z-scored marginal] stream.
    u = u_ref[...]                                      # (Bt, F+P) f32
    h = jnp.dot(u.astype(mm), w_in_ref[0], preferred_element_type=jnp.float32)
    h = h + b_in_ref[0]                                 # (Bt, K) f32, all lanes used

    # Residual blocks.  BN is pre-folded to scale/shift (eval mode) and the first linear's
    # bias of each block is pre-folded into the following BN shift.  Block-diagonal (K,K)
    # weights keep the Pc marginal MLPs independent while filling the MXU tile.
    # TODO(synk): for num_blocks > ~4 switch to lax.fori_loop(unroll=2) to bound vreg live set.
    num_layers = blk_w_ref.shape[1]                     # 2 * num_blocks (static)
    for blk in range(num_layers // 2):
        l0, l1 = 2 * blk, 2 * blk + 1
        t = h * bn_scale_ref[0, l0] + bn_shift_ref[0, l0]
        t = jnp.maximum(t, 0.0)
        t = jnp.dot(t.astype(mm), blk_w_ref[0, l0], preferred_element_type=jnp.float32)
        t = t * bn_scale_ref[0, l1] + bn_shift_ref[0, l1]     # blk_b[l0] folded in here
        t = jnp.maximum(t, 0.0)
        # TODO(synk): dropout is identity in eval mode; training-mode dropout not implemented.
        t = jnp.dot(t.astype(mm), blk_w_ref[0, l1], preferred_element_type=jnp.float32)
        t = t + blk_b_ref[0, blk]
        h = h + t

    # Final per-channel projection to one logit, lane-dense as (PO, Bt).  Contract the lane
    # axis of both operands (no explicit activation transpose through the XLU).
    out = lax.dot_general(w_out_ref[0], h.astype(mm),
                          (((1,), (1,)), ((), ())),
                          preferred_element_type=jnp.float32)
    out_ref[0] = (out + b_out_ref[0]).astype(out_ref.dtype)


# ---------------------- one-time parameter packing (hoisted prep) ----------------------

def pack_params(raw, matmul_dtype=jnp.bfloat16, lane_target=None, vmem_cap=None):
    """Fold BN + biases, transpose weights to (in,out), pack Pc channels per K lanes.

    Done once; the per-forward wrapper does no weight transposes or layout work.
    """
    auto_lane, auto_vmem = _tpu_defaults()
    lane_target = auto_lane if lane_target is None else int(lane_target)
    vmem_cap = auto_vmem if vmem_cap is None else int(vmem_cap)

    w_in = np.asarray(raw["w_in"], np.float32)           # (P, H, F+1)  torch (out, in)
    P, H, Fin = w_in.shape
    F = Fin - 1
    blk_w = np.asarray(raw["blk_w"], np.float32)         # (P, NL, H, H) torch (out, in)
    NL = int(blk_w.shape[1])

    # Channel-packing geometry: power-of-two channels per block; H zero-padded so K = Pc*H_pad
    # lands exactly on the lane target (no under-filled vreg / MXU columns for awkward H).
    if H <= lane_target:
        Pc = 1 << int(np.floor(np.log2(max(1, lane_target // H))))
        H_pad = lane_target // Pc
    else:
        Pc = 1
        H_pad = -(-H // 128) * 128
    K = Pc * H_pad
    Cb = -(-P // Pc)
    P_pad = Cb * Pc
    PO = -(-Pc // 8) * 8                                 # sublane-aligned output rows
    dh = H_pad - H

    def hpad(a, axes):
        if dh == 0:
            return a
        pads = [(0, 0)] * a.ndim
        for ax in axes:
            pads[ax] = (0, dh)
        return np.pad(a, pads)

    def cpad(a):
        if P_pad == P:
            return a
        return np.pad(a, [(0, P_pad - P)] + [(0, 0)] * (a.ndim - 1))

    b_in = hpad(np.asarray(raw["b_in"], np.float32), [1])               # (P, H_pad)
    blk_w = hpad(blk_w, [2, 3])                                         # (P, NL, H_pad, H_pad)
    blk_b = hpad(np.asarray(raw["blk_b"], np.float32), [2])             # (P, NL, H_pad)
    gamma = hpad(np.asarray(raw["bn_gamma"], np.float32), [2])
    beta = hpad(np.asarray(raw["bn_beta"], np.float32), [2])
    mean = hpad(np.asarray(raw["bn_mean"], np.float32), [2])
    var = hpad(np.asarray(raw["bn_var"], np.float32), [2])
    w_out = hpad(np.asarray(raw["w_out"], np.float32)[:, 0, :], [1])    # (P, H_pad)
    b_out = np.asarray(raw["b_out"], np.float32)[:, 0]                  # (P,)

    # Eval-mode BatchNorm fold, plus exact fold of each block's first linear bias into the
    # next BN shift:  scale1*(tW0 + b0) + shift1 == scale1*(tW0) + (shift1 + scale1*b0).
    bn_scale = gamma / np.sqrt(var + BN_EPS)                            # (P, NL, H_pad)
    bn_shift = beta - mean * bn_scale
    bn_shift[:, 1::2] += blk_b[:, 0::2] * bn_scale[:, 1::2]
    blk_b_odd = blk_b[:, 1::2]                                          # (P, NL/2, H_pad)

    # Transpose to (in, out) once.
    w_in_io = np.transpose(hpad(w_in, [1]), (0, 2, 1))                  # (P, F+1, H_pad)
    w_in_x = w_in_io[:, :F, :]                                          # (P, F, H_pad)
    w_in_z = w_in_io[:, F, :]                                           # (P, H_pad)
    blk_w_io = np.transpose(blk_w, (0, 1, 3, 2))                        # (P, NL, Hin, Hout)

    # Fused initial weight: rows 0..F-1 are the shared feature weights (dense per block),
    # row F+g is the z-score'd marginal g routed only into its own channel's lanes.
    FP = F + P
    w_in_u = np.zeros((Cb, FP, K), np.float32)
    blk_w_p = np.zeros((Cb, NL, K, K), np.float32)
    w_out_p = np.zeros((Cb, PO, K), np.float32)
    b_out_p = np.zeros((Cb, PO, 1), np.float32)
    for cb in range(Cb):
        for c in range(Pc):
            g = cb * Pc + c
            if g >= P:
                continue
            sl = slice(c * H_pad, (c + 1) * H_pad)
            w_in_u[cb, :F, sl] = w_in_x[g]
            w_in_u[cb, F + g, sl] = w_in_z[g]
            blk_w_p[cb, :, sl, sl] = blk_w_io[g]
            w_out_p[cb, c, sl] = w_out[g]
            b_out_p[cb, c, 0] = b_out[g]

    def pack_nlh(a):                                    # (P, L, H_pad) -> (Cb, L, 1, K)
        L = a.shape[1]
        return (cpad(a).reshape(Cb, Pc, L, H_pad)
                .transpose(0, 2, 1, 3).reshape(Cb, L, 1, K))

    b_in_p = cpad(b_in).reshape(Cb, 1, K)
    blk_b_p = pack_nlh(blk_b_odd)
    bn_scale_p = pack_nlh(bn_scale)
    bn_shift_p = pack_nlh(bn_shift)

    md, f32 = matmul_dtype, jnp.float32
    # TODO(synk): on v6e/v7x the BN/relu chain could run in bf16 (native VPU) for extra VPU
    # headroom; kept f32 here so the same kernel is exact-enough on v5e and under tight rtol.
    return dict(
        F=F, P=P, NL=NL, Pc=Pc, Cb=Cb, K=K, PO=PO, vmem_cap=vmem_cap,
        w_in_u=jnp.asarray(w_in_u, md),
        b_in=jnp.asarray(b_in_p, f32),
        blk_w=jnp.asarray(blk_w_p, md),
        blk_b=jnp.asarray(blk_b_p, f32),
        bn_scale=jnp.asarray(bn_scale_p, f32),
        bn_shift=jnp.asarray(bn_shift_p, f32),
        w_out=jnp.asarray(w_out_p, md),
        b_out=jnp.asarray(b_out_p, f32),
        z_mean=jnp.asarray(raw["z_mean"], f32).reshape(1, P),
        z_inv_std=(1.0 / jnp.asarray(raw["z_std"], f32)).reshape(1, P),
    )


# ----------------------------------- forward wrapper -----------------------------------

def marginal_classifier_pallas(x, z, pp, batch_tile=None):
    """Channeled residual MLP (MarginalClassifier + ParameterTransform z-score) on TPU."""
    B, F = x.shape
    P = z.shape[1]
    assert F == pp["F"] and P == pp["P"]
    Cb, Pc, K, PO, NL = pp["Cb"], pp["Pc"], pp["K"], pp["PO"], pp["NL"]
    FP = F + P

    # z-score + concat once in XLA (fused elementwise); pad AFTER the z-score so zero z_std
    # can never produce inf/NaN in padded rows.
    zt = (z.astype(jnp.float32) - pp["z_mean"]) * pp["z_inv_std"]
    u = jnp.concatenate([x.astype(jnp.float32), zt], axis=1)            # (B, F+P)

    # Per-step footprint model: double-buffered inputs/outputs + live activations.
    mmb = pp["w_in_u"].dtype.itemsize
    wbytes = (NL * K * K + FP * K + PO * K) * mmb \
        + (2 * NL * K + (NL // 2) * K + K + PO) * 4
    vmem_cap = pp["vmem_cap"]

    def footprint(bt):
        return 2 * (bt * FP * 4 + wbytes + PO * bt * 4) + 6 * bt * K * 4

    # Batch tile: largest candidate that fits the VMEM budget (amortizes ~0.35us/step).
    B_pad = -(-B // 8) * 8
    if batch_tile is None:
        Bt = 128
        for cand in (4096, 2048, 1024, 512, 256):
            if footprint(cand) <= vmem_cap:
                Bt = cand
                break
    else:
        Bt = max(8, -(-int(batch_tile) // 8) * 8)

    if B_pad <= Bt:
        Bt = B_pad
        # v7x megacore: with a single channel block, split the batch so both TCs get steps.
        if Cb == 1 and B_pad >= 256:
            half = (B_pad // 2) // 128 * 128
            if half >= 128:
                Bt = half
    else:
        Bt = max(128, Bt // 128 * 128)      # keep output tiles lane-dense when batch-tiled
    B_pad = -(-B_pad // Bt) * Bt
    nb = B_pad // Bt
    if B_pad != B:
        u = jnp.pad(u, ((0, B_pad - B), (0, 0)))

    vmem_limit = int(min(vmem_cap, max(32 * 1024 * 1024, footprint(Bt) * 5 // 4)))

    # Grid ordering: keep the larger operand VMEM-resident across the inner axis.
    channel_major = wbytes >= Bt * FP * 4
    if channel_major:
        grid = (Cb, nb)
        c_of = lambda i, j: i
        b_of = lambda i, j: j
    else:
        grid = (nb, Cb)
        c_of = lambda i, j: j
        b_of = lambda i, j: i

    out = pl.pallas_call(
        lre_1dim_kernel,
        out_shape=jax.ShapeDtypeStruct((Cb, PO, B_pad), jnp.float32),
        grid=grid,
        in_specs=[
            pl.BlockSpec((Bt, FP), lambda i, j: (b_of(i, j), 0)),              # fused input
            pl.BlockSpec((1, FP, K), lambda i, j: (c_of(i, j), 0, 0)),         # initial weight
            pl.BlockSpec((1, 1, K), lambda i, j: (c_of(i, j), 0, 0)),          # initial bias
            pl.BlockSpec((1, NL, K, K), lambda i, j: (c_of(i, j), 0, 0, 0)),   # block-diag W
            pl.BlockSpec((1, NL // 2, 1, K), lambda i, j: (c_of(i, j), 0, 0, 0)),  # odd biases
            pl.BlockSpec((1, NL, 1, K), lambda i, j: (c_of(i, j), 0, 0, 0)),   # folded BN scale
            pl.BlockSpec((1, NL, 1, K), lambda i, j: (c_of(i, j), 0, 0, 0)),   # folded BN shift
            pl.BlockSpec((1, PO, K), lambda i, j: (c_of(i, j), 0, 0)),         # output weights
            pl.BlockSpec((1, PO, 1), lambda i, j: (c_of(i, j), 0, 0)),         # output biases
        ],
        out_specs=pl.BlockSpec((1, PO, Bt), lambda i, j: (c_of(i, j), 0, b_of(i, j))),
        compiler_params=pltpu.CompilerParams(
            dimension_semantics=("parallel", "parallel"),
            vmem_limit_bytes=vmem_limit),
    )(u, pp["w_in_u"], pp["b_in"],
      pp["blk_w"], pp["blk_b"], pp["bn_scale"], pp["bn_shift"],
      pp["w_out"], pp["b_out"])

    # (Cb, PO, B_pad) -> (B, P); tiny XLA slice/reshape/transpose on the final logits only.
    logits = out[:, :Pc, :].reshape(Cb * Pc, B_pad)[:P, :B]
    return jnp.transpose(logits)


def lre_forward(x, z, packed_params, varnames="z", batch_tile=None):
    """Full LogRatioEstimator_1dim.forward (eval mode)."""
    x, z = equalize_tensors(x, z)
    logratios = marginal_classifier_pallas(x, z, packed_params, batch_tile=batch_tile)
    if isinstance(varnames, list):
        parnames = np.array([[v] for v in varnames])
    else:
        parnames = np.array([["%s[%i]" % (varnames, i)] for i in range(z.shape[1])])
    return LogRatioSamples(
        logratios=logratios,
        params=z[..., None],
        parnames=parnames,
        metadata={"type": "MLP1d"},
    )


# ------------------------- deterministic parameter initialization -------------------------

def init_params(key, num_features, num_params, hidden_features=64, num_blocks=2):
    """Raw, PyTorch-convention parameters of the channeled residual MLP."""
    F, P, H = num_features, num_params, hidden_features
    NL = 2 * num_blocks
    Fin = F + 1                                     # features + 1-dim marginal block
    ks = jax.random.split(key, 10)

    w_in = jax.random.normal(ks[0], (P, H, Fin), jnp.float32) / np.sqrt(Fin)
    b_in = 0.01 * jax.random.normal(ks[1], (P, H), jnp.float32)
    blk_w = jax.random.normal(ks[2], (P, NL, H, H), jnp.float32) / np.sqrt(H)
    blk_b = 0.01 * jax.random.normal(ks[3], (P, NL, H), jnp.float32)

    bn_gamma = 1.0 + 0.1 * jax.random.normal(ks[4], (P, NL, H), jnp.float32)
    bn_beta = 0.1 * jax.random.normal(ks[5], (P, NL, H), jnp.float32)
    bn_mean = 0.1 * jax.random.normal(ks[6], (P, NL, H), jnp.float32)
    bn_var = jnp.abs(1.0 + 0.1 * jax.random.normal(ks[7], (P, NL, H), jnp.float32))

    w_out = jax.random.normal(ks[8], (P, 1, H), jnp.float32) / np.sqrt(H)
    b_out = 0.01 * jax.random.normal(ks[9], (P, 1), jnp.float32)

    # ParameterTransform online z-score running stats (eval mode: fixed buffers).
    z_mean = 0.05 * jnp.arange(P, dtype=jnp.float32)
    z_std = 1.0 + 0.1 * jnp.arange(P, dtype=jnp.float32)

    return dict(w_in=w_in, b_in=b_in, blk_w=blk_w, blk_b=blk_b,
                bn_gamma=bn_gamma, bn_beta=bn_beta, bn_mean=bn_mean, bn_var=bn_var,
                w_out=w_out, b_out=b_out, z_mean=z_mean, z_std=z_std)


# ----------------------------- pure-JAX reference (correctness) -----------------------------

def reference_forward(x, z, raw, matmul_dtype=jnp.float32):
    """Same math as the PyTorch module (eval), with the kernel's matmul dtype policy."""
    x, z = equalize_tensors(x, z)
    B = x.shape[0]
    P = z.shape[1]
    md = matmul_dtype

    zt = (z - raw["z_mean"][None, :]) / raw["z_std"][None, :]                  # (B, P)
    fb = jnp.broadcast_to(x[:, None, :], (B, P, x.shape[1]))
    combined = jnp.concatenate([fb, zt[:, :, None]], axis=2)                   # (B, P, F+1)

    bn_scale = raw["bn_gamma"] / jnp.sqrt(raw["bn_var"] + BN_EPS)              # (P, NL, H)
    bn_shift = raw["bn_beta"] - raw["bn_mean"] * bn_scale

    h = jnp.einsum("bpi,phi->bph", combined.astype(md), raw["w_in"].astype(md),
                   preferred_element_type=jnp.float32) + raw["b_in"][None]
    NB = raw["blk_w"].shape[1] // 2
    for blk in range(NB):
        l0, l1 = 2 * blk, 2 * blk + 1
        t = h * bn_scale[:, l0][None] + bn_shift[:, l0][None]
        t = jax.nn.relu(t)
        t = jnp.einsum("bpi,poi->bpo", t.astype(md), raw["blk_w"][:, l0].astype(md),
                       preferred_element_type=jnp.float32) + raw["blk_b"][:, l0][None]
        t = t * bn_scale[:, l1][None] + bn_shift[:, l1][None]
        t = jax.nn.relu(t)
        t = jnp.einsum("bpi,poi->bpo", t.astype(md), raw["blk_w"][:, l1].astype(md),
                       preferred_element_type=jnp.float32) + raw["blk_b"][:, l1][None]
        h = h + t
    out = jnp.einsum("bpi,poi->bpo", h.astype(md), raw["w_out"].astype(md),
                     preferred_element_type=jnp.float32) + raw["b_out"][None]
    return out[..., 0]                                                         # (B, P)


# ------------------------------------------ main ------------------------------------------

if __name__ == "__main__":
    num_features = 16      # length of feature vector x
    num_params = 4         # number of 1-dim marginals
    batch = 8
    hidden_features = 32
    num_blocks = 2

    key = jax.random.PRNGKey(0)
    kx, kz, kp = jax.random.split(key, 3)
    x = jax.random.normal(kx, (batch, num_features), jnp.float32)
    z = jax.random.normal(kz, (batch, num_params), jnp.float32)
    raw = init_params(kp, num_features, num_params, hidden_features, num_blocks)

    # f32 matmul operands, auto lane target for this chip: tight structural check.
    pp32 = pack_params(raw, matmul_dtype=jnp.float32)
    w32 = lre_forward(x, z, pp32, varnames="theta")
    jax.block_until_ready(w32.logratios)
    ref32 = reference_forward(x, z, raw, matmul_dtype=jnp.float32)
    np.testing.assert_allclose(np.asarray(w32.logratios), np.asarray(ref32),
                               rtol=1e-3, atol=1e-3)
    assert w32.logratios.shape == (batch, num_params)
    assert w32.params.shape == (batch, num_params, 1)
    assert w32.parnames.shape == (num_params, 1)

    # bf16 matmul operands (v6e/v7x MXU-native), f32 accumulation + f32 BN/relu chain.
    ppbf = pack_params(raw, matmul_dtype=jnp.bfloat16)
    wbf = lre_forward(x, z, ppbf, varnames="theta")
    jax.block_until_ready(wbf.logratios)
    refbf = reference_forward(x, z, raw, matmul_dtype=jnp.bfloat16)
    np.testing.assert_allclose(np.asarray(wbf.logratios), np.asarray(refbf),
                               rtol=1e-2, atol=1e-2)

    # Exercise batch tiling + batch padding + channel padding (Cb > 1) with lane_target=128.
    num_params2, batch2 = 6, 272
    x2 = jax.random.normal(jax.random.PRNGKey(1), (batch2, num_features), jnp.float32)
    z2 = jax.random.normal(jax.random.PRNGKey(2), (batch2, num_params2), jnp.float32)
    raw2 = init_params(jax.random.PRNGKey(3), num_features, num_params2,
                       hidden_features, num_blocks)
    pp2 = pack_params(raw2, matmul_dtype=jnp.float32, lane_target=128)
    w2 = lre_forward(x2, z2, pp2, varnames="theta", batch_tile=128)
    jax.block_until_ready(w2.logratios)
    ref2 = reference_forward(x2, z2, raw2, matmul_dtype=jnp.float32)
    np.testing.assert_allclose(np.asarray(w2.logratios), np.asarray(ref2),
                               rtol=1e-3, atol=1e-3)
    assert w2.logratios.shape == (batch2, num_params2)

    print("KERNEL_OK")
</pallas_src>

<mosaic_0001>
module attributes {stable_mosaic.version = 11 : i64} {
  func.func @lre_1dim_kernel(%arg0: i32, %arg1: i32, %arg2: memref<8x20xf32, #tpu.memory_space<vmem>>, %arg3: memref<1x20x256xf32, #tpu.memory_space<vmem>>, %arg4: memref<1x1x256xf32, #tpu.memory_space<vmem>>, %arg5: memref<1x4x256x256xf32, #tpu.memory_space<vmem>>, %arg6: memref<1x2x1x256xf32, #tpu.memory_space<vmem>>, %arg7: memref<1x4x1x256xf32, #tpu.memory_space<vmem>>, %arg8: memref<1x4x1x256xf32, #tpu.memory_space<vmem>>, %arg9: memref<1x8x256xf32, #tpu.memory_space<vmem>>, %arg10: memref<1x8x1xf32, #tpu.memory_space<vmem>>, %arg11: memref<1x8x8xf32, #tpu.memory_space<vmem>>) attributes {dimension_semantics = [#tpu.dimension_semantics<parallel>, #tpu.dimension_semantics<parallel>], iteration_bounds = array<i64: 1, 1>, scalar_prefetch = 0 : i64, scratch_operands = 0 : i64, tpu.core_type = #tpu.core_type<tc>, window_params = [{transform_indices = @transform_0, window_bounds = array<i64: 8, 20>}, {transform_indices = @transform_1, window_bounds = array<i64: 1, 20, 256>}, {transform_indices = @transform_2, window_bounds = array<i64: 1, 1, 256>}, {transform_indices = @transform_3, window_bounds = array<i64: 1, 4, 256, 256>}, {transform_indices = @transform_4, window_bounds = array<i64: 1, 2, 1, 256>}, {transform_indices = @transform_5, window_bounds = array<i64: 1, 4, 1, 256>}, {transform_indices = @transform_6, window_bounds = array<i64: 1, 4, 1, 256>}, {transform_indices = @transform_7, window_bounds = array<i64: 1, 8, 256>}, {transform_indices = @transform_8, window_bounds = array<i64: 1, 8, 1>}, {transform_indices = @transform_9, window_bounds = array<i64: 1, 8, 8>}]} {
    %c0 = arith.constant 0 : index
    %c0_0 = arith.constant 0 : index
    %0 = vector.load %arg2[%c0, %c0_0] : memref<8x20xf32, #tpu.memory_space<vmem>>, vector<8x20xf32>
    %c0_1 = arith.constant 0 : index
    %c0_2 = arith.constant 0 : index
    %c0_3 = arith.constant 0 : index
    %1 = vector.load %arg3[%c0_1, %c0_2, %c0_3] : memref<1x20x256xf32, #tpu.memory_space<vmem>>, vector<1x20x256xf32>
    %2 = vector.shape_cast %1 : vector<1x20x256xf32> to vector<20x256xf32>
    %cst = arith.constant dense<0.000000e+00> : vector<8x256xf32>
    %3 = tpu.matmul %0, %2, %cst {dimension_numbers = #tpu.dot_dimension_numbers<[1], [0], [0], [1], [0, 0, 1, 1], [], []>} : vector<8x20xf32>, vector<20x256xf32>, vector<8x256xf32> -> vector<8x256xf32>
    %c0_4 = arith.constant 0 : index
    %c0_5 = arith.constant 0 : index
    %c0_6 = arith.constant 0 : index
    %4 = vector.load %arg4[%c0_4, %c0_5, %c0_6] : memref<1x1x256xf32, #tpu.memory_space<vmem>>, vector<1x1x256xf32>
    %5 = vector.shape_cast %4 : vector<1x1x256xf32> to vector<1x256xf32>
    %6 = vector.broadcast %5 : vector<1x256xf32> to vector<8x256xf32>
    %7 = arith.addf %3, %6 : vector<8x256xf32>
    %c0_7 = arith.constant 0 : index
    %c0_8 = arith.constant 0 : index
    %c0_9 = arith.constant 0 : index
    %c0_10 = arith.constant 0 : index
    %8 = vector.load %arg7[%c0_7, %c0_8, %c0_9, %c0_10] : memref<1x4x1x256xf32, #tpu.memory_space<vmem>>, vector<1x1x1x256xf32>
    %9 = vector.shape_cast %8 : vector<1x1x1x256xf32> to vector<1x256xf32>
    %10 = vector.broadcast %9 : vector<1x256xf32> to vector<8x256xf32>
    %11 = arith.mulf %7, %10 : vector<8x256xf32>
    %c0_11 = arith.constant 0 : index
    %c0_12 = arith.constant 0 : index
    %c0_13 = arith.constant 0 : index
    %c0_14 = arith.constant 0 : index
    %12 = vector.load %arg8[%c0_11, %c0_12, %c0_13, %c0_14] : memref<1x4x1x256xf32, #tpu.memory_space<vmem>>, vector<1x1x1x256xf32>
    %13 = vector.shape_cast %12 : vector<1x1x1x256xf32> to vector<1x256xf32>
    %14 = vector.broadcast %13 : vector<1x256xf32> to vector<8x256xf32>
    %15 = arith.addf %11, %14 : vector<8x256xf32>
    %cst_15 = arith.constant 0.000000e+00 : f32
    %16 = vector.broadcast %cst_15 : f32 to vector<8x256xf32>
    %17 = arith.maximumf %15, %16 : vector<8x256xf32>
    %c0_16 = arith.constant 0 : index
    %c0_17 = arith.constant 0 : index
    %c0_18 = arith.constant 0 : index
    %c0_19 = arith.constant 0 : index
    %18 = vector.load %arg5[%c0_16, %c0_17, %c0_18, %c0_19] : memref<1x4x256x256xf32, #tpu.memory_space<vmem>>, vector<1x1x256x256xf32>
    %19 = vector.shape_cast %18 : vector<1x1x256x256xf32> to vector<256x256xf32>
    %cst_20 = arith.constant dense<0.000000e+00> : vector<8x256xf32>
    %20 = tpu.matmul %17, %19, %cst_20 {dimension_numbers = #tpu.dot_dimension_numbers<[1], [0], [0], [1], [0, 0, 1, 1], [], []>} : vector<8x256xf32>, vector<256x256xf32>, vector<8x256xf32> -> vector<8x256xf32>
    %c0_21 = arith.constant 0 : index
    %c1 = arith.constant 1 : index
    %c0_22 = arith.constant 0 : index
    %c0_23 = arith.constant 0 : index
    %21 = vector.load %arg7[%c0_21, %c1, %c0_22, %c0_23] : memref<1x4x1x256xf32, #tpu.memory_space<vmem>>, vector<1x1x1x256xf32>
    %22 = vector.shape_cast %21 : vector<1x1x1x256xf32> to vector<1x256xf32>
    %23 = vector.broadcast %22 : vector<1x256xf32> to vector<8x256xf32>
    %24 = arith.mulf %20, %23 : vector<8x256xf32>
    %c0_24 = arith.constant 0 : index
    %c1_25 = arith.constant 1 : index
    %c0_26 = arith.constant 0 : index
    %c0_27 = arith.constant 0 : index
    %25 = vector.load %arg8[%c0_24, %c1_25, %c0_26, %c0_27] : memref<1x4x1x256xf32, #tpu.memory_space<vmem>>, vector<1x1x1x256xf32>
    %26 = vector.shape_cast %25 : vector<1x1x1x256xf32> to vector<1x256xf32>
    %27 = vector.broadcast %26 : vector<1x256xf32> to vector<8x256xf32>
    %28 = arith.addf %24, %27 : vector<8x256xf32>
    %cst_28 = arith.constant 0.000000e+00 : f32
    %29 = vector.broadcast %cst_28 : f32 to vector<8x256xf32>
    %30 = arith.maximumf %28, %29 : vector<8x256xf32>
    %c0_29 = arith.constant 0 : index
    %c1_30 = arith.constant 1 : index
    %c0_31 = arith.constant 0 : index
    %c0_32 = arith.constant 0 : index
    %31 = vector.load %arg5[%c0_29, %c1_30, %c0_31, %c0_32] : memref<1x4x256x256xf32, #tpu.memory_space<vmem>>, vector<1x1x256x256xf32>
    %32 = vector.shape_cast %31 : vector<1x1x256x256xf32> to vector<256x256xf32>
    %cst_33 = arith.constant dense<0.000000e+00> : vector<8x256xf32>
    %33 = tpu.matmul %30, %32, %cst_33 {dimension_numbers = #tpu.dot_dimension_numbers<[1], [0], [0], [1], [0, 0, 1, 1], [], []>} : vector<8x256xf32>, vector<256x256xf32>, vector<8x256xf32> -> vector<8x256xf32>
    %c0_34 = arith.constant 0 : index
    %c0_35 = arith.constant 0 : index
    %c0_36 = arith.constant 0 : index
    %c0_37 = arith.constant 0 : index
    %34 = vector.load %arg6[%c0_34, %c0_35, %c0_36, %c0_37] : memref<1x2x1x256xf32, #tpu.memory_space<vmem>>, vector<1x1x1x256xf32>
    %35 = vector.shape_cast %34 : vector<1x1x1x256xf32> to vector<1x256xf32>
    %36 = vector.broadcast %35 : vector<1x256xf32> to vector<8x256xf32>
    %37 = arith.addf %33, %36 : vector<8x256xf32>
    %38 = arith.addf %7, %37 : vector<8x256xf32>
    %c0_38 = arith.constant 0 : index
    %c2 = arith.constant 2 : index
    %c0_39 = arith.constant 0 : index
    %c0_40 = arith.constant 0 : index
    %39 = vector.load %arg7[%c0_38, %c2, %c0_39, %c0_40] : memref<1x4x1x256xf32, #tpu.memory_space<vmem>>, vector<1x1x1x256xf32>
    %40 = vector.shape_cast %39 : vector<1x1x1x256xf32> to vector<1x256xf32>
    %41 = vector.broadcast %40 : vector<1x256xf32> to vector<8x256xf32>
    %42 = arith.mulf %38, %41 : vector<8x256xf32>
    %c0_41 = arith.constant 0 : index
    %c2_42 = arith.constant 2 : index
    %c0_43 = arith.constant 0 : index
    %c0_44 = arith.constant 0 : index
    %43 = vector.load %arg8[%c0_41, %c2_42, %c0_43, %c0_44] : memref<1x4x1x256xf32, #tpu.memory_space<vmem>>, vector<1x1x1x256xf32>
    %44 = vector.shape_cast %43 : vector<1x1x1x256xf32> to vector<1x256xf32>
    %45 = vector.broadcast %44 : vector<1x256xf32> to vector<8x256xf32>
    %46 = arith.addf %42, %45 : vector<8x256xf32>
    %cst_45 = arith.constant 0.000000e+00 : f32
    %47 = vector.broadcast %cst_45 : f32 to vector<8x256xf32>
    %48 = arith.maximumf %46, %47 : vector<8x256xf32>
    %c0_46 = arith.constant 0 : index
    %c2_47 = arith.constant 2 : index
    %c0_48 = arith.constant 0 : index
    %c0_49 = arith.constant 0 : index
    %49 = vector.load %arg5[%c0_46, %c2_47, %c0_48, %c0_49] : memref<1x4x256x256xf32, #tpu.memory_space<vmem>>, vector<1x1x256x256xf32>
    %50 = vector.shape_cast %49 : vector<1x1x256x256xf32> to vector<256x256xf32>
    %cst_50 = arith.constant dense<0.000000e+00> : vector<8x256xf32>
    %51 = tpu.matmul %48, %50, %cst_50 {dimension_numbers = #tpu.dot_dimension_numbers<[1], [0], [0], [1], [0, 0, 1, 1], [], []>} : vector<8x256xf32>, vector<256x256xf32>, vector<8x256xf32> -> vector<8x256xf32>
    %c0_51 = arith.constant 0 : index
    %c3 = arith.constant 3 : index
    %c0_52 = arith.constant 0 : index
    %c0_53 = arith.constant 0 : index
    %52 = vector.load %arg7[%c0_51, %c3, %c0_52, %c0_53] : memref<1x4x1x256xf32, #tpu.memory_space<vmem>>, vector<1x1x1x256xf32>
    %53 = vector.shape_cast %52 : vector<1x1x1x256xf32> to vector<1x256xf32>
    %54 = vector.broadcast %53 : vector<1x256xf32> to vector<8x256xf32>
    %55 = arith.mulf %51, %54 : vector<8x256xf32>
    %c0_54 = arith.constant 0 : index
    %c3_55 = arith.constant 3 : index
    %c0_56 = arith.constant 0 : index
    %c0_57 = arith.constant 0 : index
    %56 = vector.load %arg8[%c0_54, %c3_55, %c0_56, %c0_57] : memref<1x4x1x256xf32, #tpu.memory_space<vmem>>, vector<1x1x1x256xf32>
    %57 = vector.shape_cast %56 : vector<1x1x1x256xf32> to vector<1x256xf32>
    %58 = vector.broadcast %57 : vector<1x256xf32> to vector<8x256xf32>
    %59 = arith.addf %55, %58 : vector<8x256xf32>
    %cst_58 = arith.constant 0.000000e+00 : f32
    %60 = vector.broadcast %cst_58 : f32 to vector<8x256xf32>
    %61 = arith.maximumf %59, %60 : vector<8x256xf32>
    %c0_59 = arith.constant 0 : index
    %c3_60 = arith.constant 3 : index
    %c0_61 = arith.constant 0 : index
    %c0_62 = arith.constant 0 : index
    %62 = vector.load %arg5[%c0_59, %c3_60, %c0_61, %c0_62] : memref<1x4x256x256xf32, #tpu.memory_space<vmem>>, vector<1x1x256x256xf32>
    %63 = vector.shape_cast %62 : vector<1x1x256x256xf32> to vector<256x256xf32>
    %cst_63 = arith.constant dense<0.000000e+00> : vector<8x256xf32>
    %64 = tpu.matmul %61, %63, %cst_63 {dimension_numbers = #tpu.dot_dimension_numbers<[1], [0], [0], [1], [0, 0, 1, 1], [], []>} : vector<8x256xf32>, vector<256x256xf32>, vector<8x256xf32> -> vector<8x256xf32>
    %c0_64 = arith.constant 0 : index
    %c1_65 = arith.constant 1 : index
    %c0_66 = arith.constant 0 : index
    %c0_67 = arith.constant 0 : index
    %65 = vector.load %arg6[%c0_64, %c1_65, %c0_66, %c0_67] : memref<1x2x1x256xf32, #tpu.memory_space<vmem>>, vector<1x1x1x256xf32>
    %66 = vector.shape_cast %65 : vector<1x1x1x256xf32> to vector<1x256xf32>
    %67 = vector.broadcast %66 : vector<1x256xf32> to vector<8x256xf32>
    %68 = arith.addf %64, %67 : vector<8x256xf32>
    %69 = arith.addf %38, %68 : vector<8x256xf32>
    %c0_68 = arith.constant 0 : index
    %c0_69 = arith.constant 0 : index
    %c0_70 = arith.constant 0 : index
    %70 = vector.load %arg9[%c0_68, %c0_69, %c0_70] : memref<1x8x256xf32, #tpu.memory_space<vmem>>, vector<1x8x256xf32>
    %71 = vector.shape_cast %70 : vector<1x8x256xf32> to vector<8x256xf32>
    %cst_71 = arith.constant dense<0.000000e+00> : vector<8x8xf32>
    %72 = tpu.matmul %71, %69, %cst_71 {dimension_numbers = #tpu.dot_dimension_numbers<[1], [1], [0], [0], [0, 0, 1, 0], [], []>} : vector<8x256xf32>, vector<8x256xf32>, vector<8x8xf32> -> vector<8x8xf32>
    %c0_72 = arith.constant 0 : index
    %c0_73 = arith.constant 0 : index
    %c0_74 = arith.constant 0 : index
    %73 = vector.load %arg10[%c0_72, %c0_73, %c0_74] : memref<1x8x1xf32, #tpu.memory_space<vmem>>, vector<1x8x1xf32>
    %74 = vector.shape_cast %73 : vector<1x8x1xf32> to vector<8x1xf32>
    %75 = vector.broadcast %74 : vector<8x1xf32> to vector<8x8xf32>
    %76 = arith.addf %72, %75 : vector<8x8xf32>
    %c0_75 = arith.constant 0 : index
    %c0_76 = arith.constant 0 : index
    %c0_77 = arith.constant 0 : index
    %77 = vector.load %arg11[%c0_75, %c0_76, %c0_77] : memref<1x8x8xf32, #tpu.memory_space<vmem>>, vector<1x8x8xf32>
    %78 = vector.shape_cast %77 : vector<1x8x8xf32> to vector<8x8xf32>
    %79 = vector.shape_cast %76 : vector<8x8xf32> to vector<1x8x8xf32>
    tpu.vector_store %arg11[%c0_75, %c0_76, %c0_77], %79 {strides = array<i32>} : memref<1x8x8xf32, #tpu.memory_space<vmem>>, vector<1x8x8xf32>,
    return
  }
  func.func @transform_0(%arg0: i32, %arg1: i32) -> (i32, i32) {
    %c0_i32 = arith.constant 0 : i32
    %c0_i32_0 = arith.constant 0 : i32
    return %arg1, %c0_i32 : i32, i32
  }
  func.func @transform_1(%arg0: i32, %arg1: i32) -> (i32, i32, i32) {
    %c0_i32 = arith.constant 0 : i32
    %c0_i32_0 = arith.constant 0 : i32
    %c0_i32_1 = arith.constant 0 : i32
    return %arg0, %c0_i32, %c0_i32_0 : i32, i32, i32
  }
  func.func @transform_2(%arg0: i32, %arg1: i32) -> (i32, i32, i32) {
    %c0_i32 = arith.constant 0 : i32
    %c0_i32_0 = arith.constant 0 : i32
    %c0_i32_1 = arith.constant 0 : i32
    return %arg0, %c0_i32, %c0_i32_0 : i32, i32, i32
  }
  func.func @transform_3(%arg0: i32, %arg1: i32) -> (i32, i32, i32, i32) {
    %c0_i32 = arith.constant 0 : i32
    %c0_i32_0 = arith.constant 0 : i32
    %c0_i32_1 = arith.constant 0 : i32
    %c0_i32_2 = arith.constant 0 : i32
    return %arg0, %c0_i32, %c0_i32_0, %c0_i32_1 : i32, i32, i32, i32
  }
  func.func @transform_4(%arg0: i32, %arg1: i32) -> (i32, i32, i32, i32) {
    %c0_i32 = arith.constant 0 : i32
    %c0_i32_0 = arith.constant 0 : i32
    %c0_i32_1 = arith.constant 0 : i32
    %c0_i32_2 = arith.constant 0 : i32
    return %arg0, %c0_i32, %c0_i32_0, %c0_i32_1 : i32, i32, i32, i32
  }
  func.func @transform_5(%arg0: i32, %arg1: i32) -> (i32, i32, i32, i32) {
    %c0_i32 = arith.constant 0 : i32
    %c0_i32_0 = arith.constant 0 : i32
    %c0_i32_1 = arith.constant 0 : i32
    %c0_i32_2 = arith.constant 0 : i32
    return %arg0, %c0_i32, %c0_i32_0, %c0_i32_1 : i32, i32, i32, i32
  }
  func.func @transform_6(%arg0: i32, %arg1: i32) -> (i32, i32, i32, i32) {
    %c0_i32 = arith.constant 0 : i32
    %c0_i32_0 = arith.constant 0 : i32
    %c0_i32_1 = arith.constant 0 : i32
    %c0_i32_2 = arith.constant 0 : i32
    return %arg0, %c0_i32, %c0_i32_0, %c0_i32_1 : i32, i32, i32, i32
  }
  func.func @transform_7(%arg0: i32, %arg1: i32) -> (i32, i32, i32) {
    %c0_i32 = arith.constant 0 : i32
    %c0_i32_0 = arith.constant 0 : i32
    %c0_i32_1 = arith.constant 0 : i32
    return %arg0, %c0_i32, %c0_i32_0 : i32, i32, i32
  }
  func.func @transform_8(%arg0: i32, %arg1: i32) -> (i32, i32, i32) {
    %c0_i32 = arith.constant 0 : i32
    %c0_i32_0 = arith.constant 0 : i32
    %c0_i32_1 = arith.constant 0 : i32
    return %arg0, %c0_i32, %c0_i32_0 : i32, i32, i32
  }
  func.func @transform_9(%arg0: i32, %arg1: i32) -> (i32, i32, i32) {
    %c0_i32 = arith.constant 0 : i32
    %c0_i32_0 = arith.constant 0 : i32
    return %arg0, %c0_i32, %arg1 : i32, i32, i32
  }
}

</mosaic_0001>

<bundles_post_ra>
// kernel: tpu_custom_call.1
= control target key start
LH: loop header
LB: loop body
LE: loop exit
PB: predicated region body
PF: predicated region fallthrough
CT: control target
= control target key end

     0   :  { %14 = vsyncpa [#allocation3], 0  ;;  %s1445_s0 = inlined_call_operand.vmem [shape: f32[8,20], index: 0, kind: input, shape index: {}]   ;;  %s1446_s1 = inlined_call_operand.vmem [shape: f32[1,20,256], index: 1, kind: input, shape index: {}]   ;;  %s1447_s2 = inlined_call_operand.vmem [shape: f32[1,1,256], index: 2, kind: input, shape index: {}]   ;;  %s1448_s3 = inlined_call_operand.hbm [shape: f32[1,4,256,256], index: 3, kind: input, shape index: {}]   ;;  %s1449_s4 = inlined_call_operand.vmem [shape: f32[1,2,1,256], index: 4, kind: input, shape index: {}]   ;;  %s1450_s5 = inlined_call_operand.vmem [shape: f32[1,4,1,256], index: 5, kind: input, shape index: {}]   ;;  %s1451_s6 = inlined_call_operand.vmem [shape: f32[1,4,1,256], index: 6, kind: input, shape index: {}]   ;;  %s1452_s7 = inlined_call_operand.vmem [shape: f32[1,8,256], index: 7, kind: input, shape index: {}]   ;;  %s1453_s8 = inlined_call_operand.vmem [shape: f32[1,8,1], index: 8, kind: input, shape index: {}]   ;;  %s1454_s9 = inlined_call_operand.hbm [shape: f32[1,8,8], index: 9, kind: output, shape index: {}]  }
   0x1   :  { %15 = vsyncpa [#allocation4], 0  ;;  %s1266_s30 = smov [#allocation2]   ;;  %s1218_s13 = scalar_lea.hbm %s1448_s3, 32768 }
   0x2   :  { %s27_s10 = sshll.u32 %s1266_s30, 4  ;;  %p1219_p0 = scmp.ne.s32.totalorder %s1448_s3, %s1218_s13  ;;  %s28_s10 = int_to_ptr.vmem [resolvable:$true] %s27_s10 }
   0x3   :  { %p1222_p1 = scmp.lt.u32.totalorder %s1218_s13, %s1448_s3 }
   0x5   :  { %p1224_p2 = pnand %p1222_p1, %p1219_p0 }
   0x7   :  { %1227 = shalt.err (!%p1224_p2)
}
   0x8   :  { %s1228_s18 = scalar_lea.vmem %s28_s10, 32768  ;;  %p1233_p4 = scmp.lt.s32.totalorder %s28_s10, %s28_s10 }
   0x9   :  { %p1229_p3 = scmp.ne.s32.totalorder %s28_s10, %s1228_s18  ;;  %p1234_p5 = scmp.lt.s32.totalorder %s1228_s18, %s1228_s18 }
   0xb   :  { %p1235_p6 = por %p1234_p5, %p1233_p4 }
   0xd   :  { %p1236_p7 = pnand %p1235_p6, %p1229_p3 }
   0xf   :  { %1239 = shalt.err (!%p1236_p7)
}
  0x10   :  { %s1267_s19 = smov 256   ;;  %s1268_s20 = smov 16  }
  0x11   :  { %33 = dma.hbm_to_vmem [thread:$0]  %s1448_s3, 32768, %s28_s10, [#allocation3], %s1267_s19, %s1267_s19, %s1268_s20  }
  0x12   :  { %1262 = dma.done.wait [#allocation3], 32768  }
  0x13   :  { %1263 = vsyncadd [#allocation3], 4294934528  ;;  %v1269_v0 = vmov 0.0   ;;  %v49_v1 = vld [vmem:[%s1446_s1 + $0x8] sm:$0xff]  ;;  %v51_v2 = vld [vmem:[%s1446_s1 + $0x18] sm:$0xff]  ;;  %vm70_vm0 = vcmask 1043456  }
  0x14   :  { %141 = vmatprep.mubr.f32.mxu0 %v1269_v0  ;;  %v48_v3 = vld [vmem:[%s1446_s1] sm:$0xff]  ;;  %v951_v4 = vpack.c.bf16 %v51_v2, %v49_v1  ;;  %v50_v5 = vld [vmem:[%s1446_s1 + $0x10] sm:$0xff]  ;;  %v53_v7 = vld [vmem:[%s1446_s1 + $0x28] sm:$0xf]  ;;  %vm66_vm1 = vcmask 162816   ;;  %vm924_vm2 = vcmask 64512  }
  0x15   :  { %v953_v6 = vpack.c.bf16 %v50_v5, %v48_v3  ;;  %v179_v8 = vld [vmem:[#allocation2 + $0x8] sm:$0xff]  ;;  %v181_v9 = vld [vmem:[#allocation2 + $0x18] sm:$0xff]  ;;  %v178_v11 = vld [vmem:[#allocation2] sm:$0xff] }
  0x16   :  { %952 = vmatprep.subr.bf16.mxu0 %v951_v4  ;;  %v955_v10 = vpack.c.bf16 %v181_v9, %v179_v8  ;;  %v180_v12 = vld [vmem:[#allocation2 + $0x10] sm:$0xff]  ;;  %v183_v13 = vld [vmem:[#allocation2 + $0x28] sm:$0xff]  ;;  %v185_v15 = vld [vmem:[#allocation2 + $0x38] sm:$0xff] }
  0x17   :  { %954 = vmatpush1.bf16.msra.mxu0 %v953_v6  ;;  %v957_v14 = vpack.c.bf16 %v180_v12, %v178_v11  ;;  %v182_v16 = vld [vmem:[#allocation2 + $0x20] sm:$0xff]  ;;  %v184_v17 = vld [vmem:[#allocation2 + $0x30] sm:$0xff]  ;;  %v959_v19 = vpack.c.bf16 %v185_v15, %v183_v13  ;;  %v187_v20 = vld [vmem:[#allocation2 + $0x48] sm:$0xff] }
  0x18   :  { %941 = vmatprep.subr.msk.mxu0 %vm70_vm0, %v53_v7  ;;  %v52_v18 = vld [vmem:[%s1446_s1 + $0x20] sm:$0xf]  ;;  %956 = vmatprep.subr.bf16.mxu1 %v955_v10  ;;  %v189_v21 = vld [vmem:[#allocation2 + $0x58] sm:$0xff]  ;;  %v961_v23 = vpack.c.bf16 %v184_v17, %v182_v16  ;;  %v188_v26 = vld [vmem:[#allocation2 + $0x50] sm:$0xff] }
  0x19   :  { %v47_v22 = vld [vmem:[%s1445_s0] sm:$0xff]  ;;  %958 = vmatpush1.bf16.msra.mxu1 %v957_v14  ;;  %v963_v24 = vpack.c.bf16 %v189_v21, %v187_v20  ;;  %v191_v27 = vld [vmem:[#allocation2 + $0x68] sm:$0xff]  ;;  %v193_v28 = vld [vmem:[#allocation2 + $0x78] sm:$0xff]  ;;  %s1271_s0 = smov [#allocation5]  }
  0x1a   :  { %960 = vmatprep.subr.bf16.mxu1 %v959_v19  ;;  %v186_v25 = vld [vmem:[#allocation2 + $0x40] sm:$0xff]  ;;  %v967_v30 = vpack.c.bf16 %v193_v28, %v191_v27  ;;  %v192_v32 = vld [vmem:[#allocation2 + $0x70] sm:$0xff]  ;;  %v195_v33 = vld [vmem:[#allocation2 + $0x88] sm:$0xff] }
  0x1b   :  { %942 = vmatpush1.msk.msra.mxu0 %vm70_vm0, %v52_v18  ;;  %v965_v29 = vpack.c.bf16 %v188_v26, %v186_v25  ;;  %v190_v31 = vld [vmem:[#allocation2 + $0x60] sm:$0xff]  ;;  %v197_v34 = vld [vmem:[#allocation2 + $0x98] sm:$0xff]  ;;  %v196_v38 = vld [vmem:[#allocation2 + $0x90] sm:$0xff] }
  0x1c   :  { %943 = vmatmul.mubr.msk.f32.vlgmr.msra.gmra.mrb[0].mxu0 %vm66_vm1, %v47_v22  ;;  %v969_v35 = vpack.c.bf16 %v192_v32, %v190_v31  ;;  %v971_v36 = vpack.c.bf16 %v197_v34, %v195_v33  ;;  %v194_v37 = vld [vmem:[#allocation2 + $0x80] sm:$0xff]  ;;  %v199_v39 = vld [vmem:[#allocation2 + $0xa8] sm:$0xff]  ;;  %v201_v40 = vld [vmem:[#allocation2 + $0xb8] sm:$0xff] }
  0x1d   :  { %962 = vmatpush1.bf16.msra.mxu1 %v961_v23  ;;  %v973_v41 = vpack.c.bf16 %v196_v38, %v194_v37  ;;  %v975_v42 = vpack.c.bf16 %v201_v40, %v199_v39  ;;  %v198_v43 = vld [vmem:[#allocation2 + $0xa0] sm:$0xff]  ;;  %v200_v44 = vld [vmem:[#allocation2 + $0xb0] sm:$0xff]  ;;  %v203_v45 = vld [vmem:[#allocation2 + $0xc8] sm:$0xff] }
  0x1e   :  { %964 = vmatprep.subr.bf16.mxu1 %v963_v24  ;;  %v205_v46 = vld [vmem:[#allocation2 + $0xd8] sm:$0xff]  ;;  %v977_v47 = vpack.c.bf16 %v200_v44, %v198_v43  ;;  %v202_v49 = vld [vmem:[#allocation2 + $0xc0] sm:$0xff]  ;;  %v204_v50 = vld [vmem:[#allocation2 + $0xd0] sm:$0xff] }
  0x1f   :  { %v979_v48 = vpack.c.bf16 %v205_v46, %v203_v45  ;;  %v207_v51 = vld [vmem:[#allocation2 + $0xe8] sm:$0xff]  ;;  %v209_v52 = vld [vmem:[#allocation2 + $0xf8] sm:$0xff]  ;;  %v981_v53 = vpack.c.bf16 %v204_v50, %v202_v49  ;;  %v206_v55 = vld [vmem:[#allocation2 + $0xe0] sm:$0xff] }
  0x20   :  { %v983_v54 = vpack.c.bf16 %v209_v52, %v207_v51  ;;  %v208_v56 = vld [vmem:[#allocation2 + $0xf0] sm:$0xff]  ;;  %v211_v57 = vld [vmem:[#allocation2 + $0x108] sm:$0xff]  ;;  %v213_v58 = vld [vmem:[#allocation2 + $0x118] sm:$0xff] }
  0x21   :  { %966 = vmatpush1.bf16.msra.mxu1 %v965_v29  ;;  %v985_v59 = vpack.c.bf16 %v208_v56, %v206_v55  ;;  %v987_v60 = vpack.c.bf16 %v213_v58, %v211_v57  ;;  %v210_v61 = vld [vmem:[#allocation2 + $0x100] sm:$0xff]  ;;  %v212_v62 = vld [vmem:[#allocation2 + $0x110] sm:$0xff]  ;;  %v215_v63 = vld [vmem:[#allocation2 + $0x128] sm:$0xff] }
  0x22   :  { %968 = vmatprep.subr.bf16.mxu1 %v967_v30  ;;  %v217_v0 = vld [vmem:[#allocation2 + $0x138] sm:$0xff]  ;;  %v989_v1 = vpack.c.bf16 %v212_v62, %v210_v61  ;;  %v214_v3 = vld [vmem:[#allocation2 + $0x120] sm:$0xff]  ;;  %v216_v4 = vld [vmem:[#allocation2 + $0x130] sm:$0xff] }
  0x23   :  { %v991_v2 = vpack.c.bf16 %v217_v0, %v215_v63  ;;  %v219_v5 = vld [vmem:[#allocation2 + $0x148] sm:$0xff]  ;;  %v221_v6 = vld [vmem:[#allocation2 + $0x158] sm:$0xff]  ;;  %v993_v7 = vpack.c.bf16 %v216_v4, %v214_v3  ;;  %v218_v9 = vld [vmem:[#allocation2 + $0x140] sm:$0xff] }
  0x24   :  { %v995_v8 = vpack.c.bf16 %v221_v6, %v219_v5  ;;  %v220_v10 = vld [vmem:[#allocation2 + $0x150] sm:$0xff]  ;;  %v223_v11 = vld [vmem:[#allocation2 + $0x168] sm:$0xff]  ;;  %v225_v12 = vld [vmem:[#allocation2 + $0x178] sm:$0xff] }
  0x25   :  { %970 = vmatpush1.bf16.msra.mxu1 %v969_v35  ;;  %v997_v13 = vpack.c.bf16 %v220_v10, %v218_v9  ;;  %v999_v14 = vpack.c.bf16 %v225_v12, %v223_v11  ;;  %v222_v15 = vld [vmem:[#allocation2 + $0x160] sm:$0xff]  ;;  %v224_v16 = vld [vmem:[#allocation2 + $0x170] sm:$0xff]  ;;  %v227_v17 = vld [vmem:[#allocation2 + $0x188] sm:$0xff] }
  0x26   :  { %972 = vmatprep.subr.bf16.mxu1 %v971_v36  ;;  %v229_v18 = vld [vmem:[#allocation2 + $0x198] sm:$0xff]  ;;  %v1001_v19 = vpack.c.bf16 %v224_v16, %v222_v15  ;;  %v226_v21 = vld [vmem:[#allocation2 + $0x180] sm:$0xff]  ;;  %v228_v22 = vld [vmem:[#allocation2 + $0x190] sm:$0xff] }
  0x27   :  { %v1003_v20 = vpack.c.bf16 %v229_v18, %v227_v17  ;;  %v231_v23 = vld [vmem:[#allocation2 + $0x1a8] sm:$0xff]  ;;  %v233_v24 = vld [vmem:[#allocation2 + $0x1b8] sm:$0xff]  ;;  %v1005_v25 = vpack.c.bf16 %v228_v22, %v226_v21  ;;  %v230_v27 = vld [vmem:[#allocation2 + $0x1a0] sm:$0xff] }
  0x28   :  { %v1007_v26 = vpack.c.bf16 %v233_v24, %v231_v23  ;;  %v232_v28 = vld [vmem:[#allocation2 + $0x1b0] sm:$0xff]  ;;  %v235_v30 = vld [vmem:[#allocation2 + $0x1c8] sm:$0xff]  ;;  %v237_v31 = vld [vmem:[#allocation2 + $0x1d8] sm:$0xff] }
  0x29   :  { %974 = vmatpush1.bf16.msra.mxu1 %v973_v41  ;;  %v1009_v29 = vpack.c.bf16 %v232_v28, %v230_v27  ;;  %v1011_v32 = vpack.c.bf16 %v237_v31, %v235_v30  ;;  %v234_v33 = vld [vmem:[#allocation2 + $0x1c0] sm:$0xff]  ;;  %v236_v34 = vld [vmem:[#allocation2 + $0x1d0] sm:$0xff]  ;;  %v239_v36 = vld [vmem:[#allocation2 + $0x1e8] sm:$0xff] }
  0x2a   :  { %976 = vmatprep.subr.bf16.mxu1 %v975_v42  ;;  %v1013_v35 = vpack.c.bf16 %v236_v34, %v234_v33  ;;  %v241_v37 = vld [vmem:[#allocation2 + $0x1f8] sm:$0xff]  ;;  %v238_v38 = vld [vmem:[#allocation2 + $0x1e0] sm:$0xff]  ;;  %v240_v40 = vld [vmem:[#allocation2 + $0x1f0] sm:$0xff] }
  0x2b   :  { %v1015_v39 = vpack.c.bf16 %v241_v37, %v239_v36  ;;  %v1017_v41 = vpack.c.bf16 %v240_v40, %v238_v38  ;;  %v347_v42 = vld [vmem:[#allocation2 + $0x208] sm:$0xff]  ;;  %v349_v43 = vld [vmem:[#allocation2 + $0x218] sm:$0xff]  ;;  %v346_v44 = vld [vmem:[#allocation2 + $0x200] sm:$0xff] }
  0x2c   :  { %v1019_v45 = vpack.c.bf16 %v349_v43, %v347_v42  ;;  %v348_v46 = vld [vmem:[#allocation2 + $0x210] sm:$0xff]  ;;  %v350_v51 = vld [vmem:[#allocation2 + $0x220] sm:$0xff]  ;;  %v383_v31 = vld [vmem:[#allocation2 + $0x328] sm:$0xff] }
  0x2d   :  { %978 = vmatpush1.bf16.msra.mxu1 %v977_v47  ;;  %v351_v47 = vld [vmem:[#allocation2 + $0x228] sm:$0xff]  ;;  %v1021_v49 = vpack.c.bf16 %v348_v46, %v346_v44  ;;  %v352_v52 = vld [vmem:[#allocation2 + $0x230] sm:$0xff]  ;;  %v354_v57 = vld [vmem:[#allocation2 + $0x240] sm:$0xff] }
  0x2e   :  { %980 = vmatprep.subr.bf16.mxu1 %v979_v48  ;;  %v353_v48 = vld [vmem:[#allocation2 + $0x238] sm:$0xff]  ;;  %1020 = vmatprep.subr.bf16.mxu0 %v1019_v45  ;;  %v1025_v55 = vpack.c.bf16 %v352_v52, %v350_v51  ;;  %v356_v58 = vld [vmem:[#allocation2 + $0x250] sm:$0xff]  ;;  %v358_v63 = vld [vmem:[#allocation2 + $0x260] sm:$0xff] }
  0x2f   :  { %v1023_v50 = vpack.c.bf16 %v353_v48, %v351_v47  ;;  %1022 = vmatpush1.bf16.msra.mxu0 %v1021_v49  ;;  %v1029_v61 = vpack.c.bf16 %v356_v58, %v354_v57  ;;  %v360_v0 = vld [vmem:[#allocation2 + $0x270] sm:$0xff]  ;;  %v362_v5 = vld [vmem:[#allocation2 + $0x280] sm:$0xff]  ;;  %v387_v37 = vld [vmem:[#allocation2 + $0x348] sm:$0xff] }
  0x30   :  { %v1033_v3 = vpack.c.bf16 %v360_v0, %v358_v63  ;;  %v364_v6 = vld [vmem:[#allocation2 + $0x290] sm:$0xff]  ;;  %v366_v11 = vld [vmem:[#allocation2 + $0x2a0] sm:$0xff]  ;;  %v389_v38 = vld [vmem:[#allocation2 + $0x358] sm:$0xff] }
  0x31   :  { %982 = vmatpush1.bf16.msra.mxu1 %v981_v53  ;;  %v355_v53 = vld [vmem:[#allocation2 + $0x248] sm:$0xff]  ;;  %1024 = vmatprep.subr.bf16.mxu0 %v1023_v50  ;;  %v1037_v9 = vpack.c.bf16 %v364_v6, %v362_v5  ;;  %v368_v12 = vld [vmem:[#allocation2 + $0x2b0] sm:$0xff]  ;;  %v370_v17 = vld [vmem:[#allocation2 + $0x2c0] sm:$0xff]  ;;  %v1059_v40 = vpack.c.bf16 %v389_v38, %v387_v37 }
  0x32   :  { %984 = vmatprep.subr.bf16.mxu1 %v983_v54  ;;  %v357_v54 = vld [vmem:[#allocation2 + $0x258] sm:$0xff]  ;;  %v1041_v15 = vpack.c.bf16 %v368_v12, %v366_v11  ;;  %v372_v18 = vld [vmem:[#allocation2 + $0x2d0] sm:$0xff]  ;;  %v374_v23 = vld [vmem:[#allocation2 + $0x2e0] sm:$0xff] }
  0x33   :  { %v1027_v56 = vpack.c.bf16 %v357_v54, %v355_v53  ;;  %1026 = vmatpush1.bf16.msra.mxu0 %v1025_v55  ;;  %v1045_v21 = vpack.c.bf16 %v372_v18, %v370_v17  ;;  %v376_v24 = vld [vmem:[#allocation2 + $0x2f0] sm:$0xff]  ;;  %v391_v43 = vld [vmem:[#allocation2 + $0x368] sm:$0xff]  ;;  %v393_v44 = vld [vmem:[#allocation2 + $0x378] sm:$0xff] }
  0x34   :  { %v1049_v27 = vpack.c.bf16 %v376_v24, %v374_v23  ;;  %v380_v30 = vld [vmem:[#allocation2 + $0x310] sm:$0xff]  ;;  %v1063_v46 = vpack.c.bf16 %v393_v44, %v391_v43  ;;  %v390_v47 = vld [vmem:[#allocation2 + $0x360] sm:$0xff]  ;;  %v395_v49 = vld [vmem:[#allocation2 + $0x388] sm:$0xff] }
  0x35   :  { %986 = vmatpush1.bf16.msra.mxu1 %v985_v59  ;;  %v359_v59 = vld [vmem:[#allocation2 + $0x268] sm:$0xff]  ;;  %1028 = vmatprep.subr.bf16.mxu0 %v1027_v56  ;;  %v384_v36 = vld [vmem:[#allocation2 + $0x330] sm:$0xff]  ;;  %v397_v50 = vld [vmem:[#allocation2 + $0x398] sm:$0xff] }
  0x36   :  { %988 = vmatprep.subr.bf16.mxu1 %v987_v60  ;;  %v361_v60 = vld [vmem:[#allocation2 + $0x278] sm:$0xff]  ;;  %v388_v42 = vld [vmem:[#allocation2 + $0x350] sm:$0xff]  ;;  %v1067_v52 = vpack.c.bf16 %v397_v50, %v395_v49  ;;  %v394_v53 = vld [vmem:[#allocation2 + $0x380] sm:$0xff] }
  0x37   :  { %v1031_v62 = vpack.c.bf16 %v361_v60, %v359_v59  ;;  %1030 = vmatpush1.bf16.msra.mxu0 %v1029_v61  ;;  %v392_v48 = vld [vmem:[#allocation2 + $0x370] sm:$0xff]  ;;  %v399_v55 = vld [vmem:[#allocation2 + $0x3a8] sm:$0xff]  ;;  %v401_v56 = vld [vmem:[#allocation2 + $0x3b8] sm:$0xff] }
  0x38   :  { %v1065_v51 = vpack.c.bf16 %v392_v48, %v390_v47  ;;  %v396_v54 = vld [vmem:[#allocation2 + $0x390] sm:$0xff]  ;;  %v1071_v58 = vpack.c.bf16 %v401_v56, %v399_v55  ;;  %v398_v59 = vld [vmem:[#allocation2 + $0x3a0] sm:$0xff]  ;;  %v533_v38 = vld [vmem:[#allocation2 + $0x428] sm:$0xff] }
  0x39   :  { %990 = vmatpush1.bf16.msra.mxu1 %v989_v1  ;;  %v363_v1 = vld [vmem:[#allocation2 + $0x288] sm:$0xff]  ;;  %1032 = vmatprep.subr.bf16.mxu0 %v1031_v62  ;;  %v1069_v57 = vpack.c.bf16 %v396_v54, %v394_v53  ;;  %v400_v60 = vld [vmem:[#allocation2 + $0x3b0] sm:$0xff]  ;;  %v56_v62 = vlaneseq  ;;  %v162_v6 = vld [vmem:[%s1451_s6] sm:$0x3] }
  0x3a   :  { %992 = vmatprep.subr.bf16.mxu1 %v991_v2  ;;  %v365_v2 = vld [vmem:[#allocation2 + $0x298] sm:$0xff]  ;;  %v1073_v61 = vpack.c.bf16 %v400_v60, %v398_v59  ;;  %v402_v24 = vld [vmem:[#allocation2 + $0x3c0] sm:$0xff]  ;;  %v530_v37 = vld [vmem:[#allocation2 + $0x410] sm:$0xff] }
  0x3b   :  { %v1035_v4 = vpack.c.bf16 %v365_v2, %v363_v1  ;;  %1034 = vmatpush1.bf16.msra.mxu0 %v1033_v3  ;;  %v57_v63 = vshrl.u32 %v56_v62, 7  ;;  %v54_v1 = vld [vmem:[%s1447_s2] sm:$0x3]  ;;  %v534_v43 = vld [vmem:[#allocation2 + $0x430] sm:$0xff]  ;;  %v537_v44 = vld [vmem:[#allocation2 + $0x448] sm:$0xff] }
  0x3c   :  { %v148_v3 = vld [vmem:[%s1450_s5] sm:$0x3]  ;;  %v538_v49 = vld [vmem:[#allocation2 + $0x450] sm:$0xff]  ;;  %v541_v50 = vld [vmem:[#allocation2 + $0x468] sm:$0xff] }
  0x3d   :  { %994 = vmatpush1.bf16.msra.mxu1 %v993_v7  ;;  %v367_v7 = vld [vmem:[#allocation2 + $0x2a8] sm:$0xff]  ;;  %1036 = vmatprep.subr.bf16.mxu0 %v1035_v4  ;;  %v1357_v0 = vsub.s32 0, %v57_v63  ;;  %v1362_v2 = vsub.s32 1, %v57_v63  ;;  %v536_v48 = vld [vmem:[#allocation2 + $0x440] sm:$0xff]  ;;  %v542_v55 = vld [vmem:[#allocation2 + $0x470] sm:$0xff] }
  0x3e   :  { %996 = vmatprep.subr.bf16.mxu1 %v995_v8  ;;  %v369_v8 = vld [vmem:[#allocation2 + $0x2b8] sm:$0xff]  ;;  %v540_v54 = vld [vmem:[#allocation2 + $0x460] sm:$0xff]  ;;  %v545_v56 = vld [vmem:[#allocation2 + $0x488] sm:$0xff] }
  0x3f   :  { %v1039_v10 = vpack.c.bf16 %v369_v8, %v367_v7  ;;  %1038 = vmatpush1.bf16.msra.mxu0 %v1037_v9  ;;  %v59_v4 = vrot.slane %v54_v1, %v1357_v0  ;;  %v63_v5 = vrot.slane %v54_v1, %v1362_v2  ;;  %v153_v7 = vrot.slane %v148_v3, %v1357_v0  ;;  %v544_v60 = vld [vmem:[#allocation2 + $0x480] sm:$0xff]  ;;  %v549_v62 = vld [vmem:[#allocation2 + $0x4a8] sm:$0xff]  ;;  %v551_v63 = vld [vmem:[#allocation2 + $0x4b8] sm:$0xff] }
  0x40   :  { %v157_v9 = vrot.slane %v148_v3, %v1362_v2  ;;  %v167_v12 = vrot.slane %v162_v6, %v1357_v0  ;;  %v1103_v3 = vpack.c.bf16 %v551_v63, %v549_v62 }
  0x41   :  { %998 = vmatpush1.bf16.msra.mxu1 %v997_v13  ;;  %v371_v13 = vld [vmem:[#allocation2 + $0x2c8] sm:$0xff]  ;;  %1040 = vmatprep.subr.bf16.mxu0 %v1039_v10 }
  0x42   :  { %1000 = vmatprep.subr.bf16.mxu1 %v999_v14  ;;  %v373_v14 = vld [vmem:[#allocation2 + $0x2d8] sm:$0xff] }
  0x43   :  { %v1043_v16 = vpack.c.bf16 %v373_v14, %v371_v13  ;;  %1042 = vmatpush1.bf16.msra.mxu0 %v1041_v15  ;;  %v171_v14 = vrot.slane %v162_v6, %v1362_v2  ;;  %v553_v6 = vld [vmem:[#allocation2 + $0x4c8] sm:$0xff] }
  0x45   :  { %1002 = vmatpush1.bf16.msra.mxu1 %v1001_v19  ;;  %v375_v19 = vld [vmem:[#allocation2 + $0x2e8] sm:$0xff]  ;;  %1044 = vmatprep.subr.bf16.mxu0 %v1043_v16 }
  0x46   :  { %1004 = vmatprep.subr.bf16.mxu1 %v1003_v20  ;;  %v377_v20 = vld [vmem:[#allocation2 + $0x2f8] sm:$0xff] }
  0x47   :  { %v1047_v22 = vpack.c.bf16 %v377_v20, %v375_v19  ;;  %1046 = vmatpush1.bf16.msra.mxu0 %v1045_v21  ;;  %v403_v21 = vld [vmem:[#allocation2 + $0x3c8] sm:$0xff] }
  0x49   :  { %1006 = vmatpush1.bf16.msra.mxu1 %v1005_v25  ;;  %v379_v25 = vld [vmem:[#allocation2 + $0x308] sm:$0xff]  ;;  %1048 = vmatprep.subr.bf16.mxu0 %v1047_v22  ;;  %v405_v22 = vld [vmem:[#allocation2 + $0x3d8] sm:$0xff] }
  0x4a   :  { %1008 = vmatprep.subr.bf16.mxu1 %v1007_v26  ;;  %v381_v26 = vld [vmem:[#allocation2 + $0x318] sm:$0xff]  ;;  %v1075_v23 = vpack.c.bf16 %v405_v22, %v403_v21 }
  0x4b   :  { %v1051_v28 = vpack.c.bf16 %v381_v26, %v379_v25  ;;  %1050 = vmatpush1.bf16.msra.mxu0 %v1049_v27  ;;  %v404_v25 = vld [vmem:[#allocation2 + $0x3d0] sm:$0xff]  ;;  %v407_v27 = vld [vmem:[#allocation2 + $0x3e8] sm:$0xff]  ;;  %v563_v21 = vld [vmem:[#allocation2 + $0x518] sm:$0xff] }
  0x4c   :  { %v1077_v26 = vpack.c.bf16 %v404_v25, %v402_v24  ;;  %v560_v24 = vld [vmem:[#allocation2 + $0x500] sm:$0xff]  ;;  %v562_v25 = vld [vmem:[#allocation2 + $0x510] sm:$0xff] }
  0x4d   :  { %1010 = vmatpush1.bf16.msra.mxu1 %v1009_v29  ;;  %v378_v29 = vld [vmem:[#allocation2 + $0x300] sm:$0xff]  ;;  %1052 = vmatprep.subr.bf16.mxu0 %v1051_v28  ;;  %v409_v28 = vld [vmem:[#allocation2 + $0x3f8] sm:$0xff] }
  0x4e   :  { %1012 = vmatprep.subr.bf16.mxu1 %v1011_v32  ;;  %v385_v32 = vld [vmem:[#allocation2 + $0x338] sm:$0xff]  ;;  %v1053_v33 = vpack.c.bf16 %v380_v30, %v378_v29  ;;  %v1079_v29 = vpack.c.bf16 %v409_v28, %v407_v27  ;;  %v406_v30 = vld [vmem:[#allocation2 + $0x3e0] sm:$0xff]  ;;  %v1117_v28 = vpack.c.bf16 %v562_v25, %v560_v24 }
  0x4f   :  { %v1055_v34 = vpack.c.bf16 %v385_v32, %v383_v31  ;;  %v408_v31 = vld [vmem:[#allocation2 + $0x3f0] sm:$0xff]  ;;  %v567_v27 = vld [vmem:[#allocation2 + $0x538] sm:$0xff]  ;;  %v696_v25 = vld [vmem:[#allocation2 + $0x600] sm:$0xff] }
  0x50   :  { %1054 = vmatpush1.bf16.msra.mxu0 %v1053_v33  ;;  %v1081_v32 = vpack.c.bf16 %v408_v31, %v406_v30  ;;  %v529_v33 = vld [vmem:[#allocation2 + $0x408] sm:$0xff]  ;;  %v564_v30 = vld [vmem:[#allocation2 + $0x520] sm:$0xff]  ;;  %v566_v31 = vld [vmem:[#allocation2 + $0x530] sm:$0xff] }
  0x51   :  { %1014 = vmatpush1.bf16.msra.mxu1 %v1013_v35  ;;  %v382_v35 = vld [vmem:[#allocation2 + $0x320] sm:$0xff]  ;;  %1056 = vmatprep.subr.bf16.mxu0 %v1055_v34  ;;  %v531_v34 = vld [vmem:[#allocation2 + $0x418] sm:$0xff] }
  0x52   :  { %1016 = vmatprep.subr.bf16.mxu1 %v1015_v39  ;;  %v1057_v39 = vpack.c.bf16 %v384_v36, %v382_v35  ;;  %v528_v35 = vld [vmem:[#allocation2 + $0x400] sm:$0xff]  ;;  %v1083_v36 = vpack.c.bf16 %v531_v34, %v529_v33  ;;  %v571_v33 = vld [vmem:[#allocation2 + $0x558] sm:$0xff]  ;;  %v1121_v34 = vpack.c.bf16 %v566_v31, %v564_v30 }
  0x53   :  { %v699_v24 = vld [vmem:[#allocation2 + $0x618] sm:$0xff] }
  0x54   :  { %1058 = vmatpush1.bf16.msra.mxu0 %v1057_v39  ;;  %v535_v39 = vld [vmem:[#allocation2 + $0x438] sm:$0xff] }
  0x55   :  { %1018 = vmatpush1.bf16.msra.mxu1 %v1017_v41  ;;  %v386_v41 = vld [vmem:[#allocation2 + $0x340] sm:$0xff]  ;;  %1060 = vmatprep.subr.bf16.mxu0 %v1059_v40  ;;  %v1085_v40 = vpack.c.bf16 %v530_v37, %v528_v35  ;;  %v570_v37 = vld [vmem:[#allocation2 + $0x550] sm:$0xff] }
  0x56   :  { %v1061_v45 = vpack.c.bf16 %v388_v42, %v386_v41  ;;  %v1087_v41 = vpack.c.bf16 %v535_v39, %v533_v38  ;;  %v532_v42 = vld [vmem:[#allocation2 + $0x420] sm:$0xff]  ;;  %1084 = vmatprep.subr.bf16.mxu1 %v1083_v36  ;;  %v573_v38 = vld [vmem:[#allocation2 + $0x568] sm:$0xff]  ;;  %v575_v39 = vld [vmem:[#allocation2 + $0x578] sm:$0xff] }
  0x57   :  { %v568_v36 = vld [vmem:[#allocation2 + $0x540] sm:$0xff] }
  0x58   :  { %1062 = vmatpush1.bf16.msra.mxu0 %v1061_v45  ;;  %v539_v45 = vld [vmem:[#allocation2 + $0x458] sm:$0xff] }
  0x59   :  { %1064 = vmatprep.subr.bf16.mxu0 %v1063_v46  ;;  %v1089_v46 = vpack.c.bf16 %v534_v43, %v532_v42  ;;  %v1091_v47 = vpack.c.bf16 %v539_v45, %v537_v44  ;;  %v572_v42 = vld [vmem:[#allocation2 + $0x560] sm:$0xff]  ;;  %v574_v43 = vld [vmem:[#allocation2 + $0x570] sm:$0xff]  ;;  %v577_v44 = vld [vmem:[#allocation2 + $0x588] sm:$0xff] }
  0x5a   :  { %v579_v45 = vld [vmem:[#allocation2 + $0x598] sm:$0xff] }
  0x5c   :  { %1066 = vmatpush1.bf16.msra.mxu0 %v1065_v51  ;;  %v543_v51 = vld [vmem:[#allocation2 + $0x478] sm:$0xff] }
  0x5d   :  { %1068 = vmatprep.subr.bf16.mxu0 %v1067_v52  ;;  %v1093_v52 = vpack.c.bf16 %v538_v49, %v536_v48  ;;  %v1095_v53 = vpack.c.bf16 %v543_v51, %v541_v50  ;;  %v576_v48 = vld [vmem:[#allocation2 + $0x580] sm:$0xff]  ;;  %v578_v49 = vld [vmem:[#allocation2 + $0x590] sm:$0xff] }
  0x5e   :  { %v1133_v50 = vpack.c.bf16 %v578_v49, %v576_v48  ;;  %v944_v51 = vld [vmem:[%s1450_s5 + $0x2] sm:$0x3] }
  0x60   :  { %1070 = vmatpush1.bf16.msra.mxu0 %v1069_v57  ;;  %v547_v57 = vld [vmem:[#allocation2 + $0x498] sm:$0xff] }
  0x61   :  { %1072 = vmatprep.subr.bf16.mxu0 %v1071_v58  ;;  %v1097_v58 = vpack.c.bf16 %v542_v55, %v540_v54  ;;  %v1099_v59 = vpack.c.bf16 %v547_v57, %v545_v56  ;;  %v323_v54 = vrot.slane %v944_v51, %v1362_v2 }
  0x64   :  { %1074 = vmatpush1.bf16.msra.mxu0 %v1073_v61  ;;  %v546_v61 = vld [vmem:[#allocation2 + $0x490] sm:$0xff] }
  0x65   :  { %1076 = vmatprep.subr.bf16.mxu0 %v1075_v23  ;;  %v1101_v1 = vpack.c.bf16 %v546_v61, %v544_v60 }
  0x68   :  { %1078 = vmatpush1.bf16.msra.mxu0 %v1077_v26  ;;  %v565_v26 = vld [vmem:[#allocation2 + $0x528] sm:$0xff] }
  0x69   :  { %1080 = vmatprep.subr.bf16.mxu0 %v1079_v29  ;;  %v1119_v29 = vpack.c.bf16 %v567_v27, %v565_v26  ;;  %v698_v27 = vld [vmem:[#allocation2 + $0x610] sm:$0xff] }
  0x6a   :  { %v1149_v30 = vpack.c.bf16 %v698_v27, %v696_v25  ;;  %v738_v27 = vld [vmem:[#allocation2 + $0x750] sm:$0xff] }
  0x6c   :  { %1082 = vmatpush1.bf16.msra.mxu0 %v1081_v32  ;;  %v569_v32 = vld [vmem:[#allocation2 + $0x548] sm:$0xff] }
  0x6d   :  { %v1123_v35 = vpack.c.bf16 %v571_v33, %v569_v32  ;;  %v700_v32 = vld [vmem:[#allocation2 + $0x620] sm:$0xff]  ;;  %v702_v33 = vld [vmem:[#allocation2 + $0x630] sm:$0xff] }
  0xef   :  { %v143_v8 = vpop.f32.mrb[0].mxu0 }
  0xf0   :  { %v1374_v10 = vadd.f32 %v143_v8, %v59_v4  ;;  %v145_v11 = vpop.f32.mrb[1].mxu0  ;;  %v548_v4 = vld [vmem:[#allocation2 + $0x4a0] sm:$0xff] }
  0xf1   :  { %v1377_v13 = vadd.f32 %v145_v11, %v63_v5  ;;  %v550_v5 = vld [vmem:[#allocation2 + $0x4b0] sm:$0xff]  ;;  %v552_v11 = vld [vmem:[#allocation2 + $0x4c0] sm:$0xff] }
  0xf2   :  { %v160_v15 = vmul.f32 %v153_v7, %v1374_v10  ;;  %v555_v7 = vld [vmem:[#allocation2 + $0x4d8] sm:$0xff]  ;;  %v1105_v8 = vpack.c.bf16 %v550_v5, %v548_v4 }
  0xf3   :  { %v161_v16 = vmul.f32 %v157_v9, %v1377_v13  ;;  %v1107_v9 = vpack.c.bf16 %v555_v7, %v553_v6  ;;  %v583_v4 = vld [vmem:[#allocation2 + $0x5b8] sm:$0xff]  ;;  %v580_v6 = vld [vmem:[#allocation2 + $0x5a0] sm:$0xff]  ;;  %v582_v7 = vld [vmem:[#allocation2 + $0x5b0] sm:$0xff] }
  0xf4   :  { %v174_v17 = vadd.f32 %v167_v12, %v160_v15  ;;  %v554_v12 = vld [vmem:[#allocation2 + $0x4d0] sm:$0xff]  ;;  %v559_v15 = vld [vmem:[#allocation2 + $0x4f8] sm:$0xff] }
  0xf5   :  { %v175_v18 = vadd.f32 %v171_v14, %v161_v16  ;;  %v557_v14 = vld [vmem:[#allocation2 + $0x4e8] sm:$0xff]  ;;  %v1109_v16 = vpack.c.bf16 %v554_v12, %v552_v11  ;;  %v587_v11 = vld [vmem:[#allocation2 + $0x5d8] sm:$0xff] }
  0xf6   :  { %v176_v20 = vmax.f32 %v174_v17, 0.0  ;;  %v1111_v17 = vpack.c.bf16 %v559_v15, %v557_v14  ;;  %v584_v14 = vld [vmem:[#allocation2 + $0x5c0] sm:$0xff]  ;;  %v586_v15 = vld [vmem:[#allocation2 + $0x5d0] sm:$0xff] }
  0xf7   :  { %v177_v19 = vmax.f32 %v175_v18, 0.0  ;;  %v556_v18 = vld [vmem:[#allocation2 + $0x4e0] sm:$0xff] }
  0xf9   :  { %306 = vmatprep.mubr.f32.mxu1 %v177_v19  ;;  %v558_v19 = vld [vmem:[#allocation2 + $0x4f0] sm:$0xff] }
  0xfa   :  { %307 = vmatmul.mubr.f32.vlgmr.msra.gmra.mrb[0].mxu1 %v176_v20  ;;  %v561_v20 = vld [vmem:[#allocation2 + $0x508] sm:$0xff]  ;;  %v1113_v22 = vpack.c.bf16 %v558_v19, %v556_v18  ;;  %v591_v18 = vld [vmem:[#allocation2 + $0x5f8] sm:$0xff] }
  0xfb   :  { %1086 = vmatpush1.bf16.msra.mxu1 %v1085_v40  ;;  %v1115_v23 = vpack.c.bf16 %v563_v21, %v561_v20  ;;  %v1125_v40 = vpack.c.bf16 %v570_v37, %v568_v36  ;;  %v588_v20 = vld [vmem:[#allocation2 + $0x5e0] sm:$0xff]  ;;  %v590_v21 = vld [vmem:[#allocation2 + $0x5f0] sm:$0xff]  ;;  %v1153_v36 = vpack.c.bf16 %v702_v33, %v700_v32 }
  0xfc   :  { %1088 = vmatprep.subr.bf16.mxu1 %v1087_v41  ;;  %v1127_v41 = vpack.c.bf16 %v575_v39, %v573_v38  ;;  %v704_v38 = vld [vmem:[#allocation2 + $0x640] sm:$0xff]  ;;  %v706_v39 = vld [vmem:[#allocation2 + $0x650] sm:$0xff] }
  0xfd   :  { %v740_v32 = vld [vmem:[#allocation2 + $0x760] sm:$0xff]  ;;  %v742_v33 = vld [vmem:[#allocation2 + $0x770] sm:$0xff] }
  0xff   :  { %1090 = vmatpush1.bf16.msra.mxu1 %v1089_v46  ;;  %v1129_v46 = vpack.c.bf16 %v574_v43, %v572_v42  ;;  %v1157_v42 = vpack.c.bf16 %v706_v39, %v704_v38  ;;  %v744_v38 = vld [vmem:[#allocation2 + $0x780] sm:$0xff]  ;;  %v746_v39 = vld [vmem:[#allocation2 + $0x790] sm:$0xff] }
 0x100   :  { %1092 = vmatprep.subr.bf16.mxu1 %v1091_v47  ;;  %v1131_v47 = vpack.c.bf16 %v579_v45, %v577_v44  ;;  %v708_v44 = vld [vmem:[#allocation2 + $0x660] sm:$0xff]  ;;  %v710_v45 = vld [vmem:[#allocation2 + $0x670] sm:$0xff] }
 0x101   :  { %v1161_v48 = vpack.c.bf16 %v710_v45, %v708_v44  ;;  %v748_v44 = vld [vmem:[#allocation2 + $0x7a0] sm:$0xff]  ;;  %v750_v45 = vld [vmem:[#allocation2 + $0x7b0] sm:$0xff] }
 0x103   :  { %1094 = vmatpush1.bf16.msra.mxu1 %v1093_v52  ;;  %v945_v52 = vld [vmem:[%s1451_s6 + $0x2] sm:$0x3] }
 0x104   :  { %1096 = vmatprep.subr.bf16.mxu1 %v1095_v53  ;;  %v319_v53 = vrot.slane %v944_v51, %v1357_v0  ;;  %v334_v55 = vrot.slane %v945_v52, %v1357_v0  ;;  %v338_v57 = vrot.slane %v945_v52, %v1362_v2  ;;  %v714_v51 = vld [vmem:[#allocation2 + $0x690] sm:$0xff]  ;;  %v717_v52 = vld [vmem:[#allocation2 + $0x6a8] sm:$0xff] }
 0x107   :  { %1098 = vmatpush1.bf16.msra.mxu1 %v1097_v58 }
 0x108   :  { %1100 = vmatprep.subr.bf16.mxu1 %v1099_v59 }
 0x10b   :  { %1102 = vmatpush1.bf16.msra.mxu1 %v1101_v1 }
 0x10c   :  { %1104 = vmatprep.subr.bf16.mxu1 %v1103_v3  ;;  %v581_v3 = vld [vmem:[#allocation2 + $0x5a8] sm:$0xff] }
 0x10d   :  { %v1135_v5 = vpack.c.bf16 %v583_v4, %v581_v3  ;;  %v727_v3 = vld [vmem:[#allocation2 + $0x6f8] sm:$0xff] }
 0x10f   :  { %1106 = vmatpush1.bf16.msra.mxu1 %v1105_v8  ;;  %v1137_v8 = vpack.c.bf16 %v582_v7, %v580_v6  ;;  %v724_v6 = vld [vmem:[#allocation2 + $0x6e0] sm:$0xff]  ;;  %v726_v7 = vld [vmem:[#allocation2 + $0x6f0] sm:$0xff] }
 0x110   :  { %1108 = vmatprep.subr.bf16.mxu1 %v1107_v9  ;;  %v585_v9 = vld [vmem:[#allocation2 + $0x5c8] sm:$0xff] }
 0x111   :  { %v1139_v12 = vpack.c.bf16 %v587_v11, %v585_v9  ;;  %v731_v9 = vld [vmem:[#allocation2 + $0x718] sm:$0xff]  ;;  %v1177_v11 = vpack.c.bf16 %v726_v7, %v724_v6  ;;  %v753_v6 = vld [vmem:[#allocation2 + $0x7c8] sm:$0xff] }
 0x112   :  { %v755_v7 = vld [vmem:[#allocation2 + $0x7d8] sm:$0xff] }
 0x113   :  { %1110 = vmatpush1.bf16.msra.mxu1 %v1109_v16  ;;  %v1141_v16 = vpack.c.bf16 %v586_v15, %v584_v14  ;;  %v728_v14 = vld [vmem:[#allocation2 + $0x700] sm:$0xff]  ;;  %v730_v15 = vld [vmem:[#allocation2 + $0x710] sm:$0xff] }
 0x114   :  { %1112 = vmatprep.subr.bf16.mxu1 %v1111_v17  ;;  %v589_v17 = vld [vmem:[#allocation2 + $0x5e8] sm:$0xff] }
 0x115   :  { %v1143_v19 = vpack.c.bf16 %v591_v18, %v589_v17  ;;  %v735_v17 = vld [vmem:[#allocation2 + $0x738] sm:$0xff]  ;;  %v1181_v18 = vpack.c.bf16 %v730_v15, %v728_v14  ;;  %v756_v15 = vld [vmem:[#allocation2 + $0x7e0] sm:$0xff] }
 0x117   :  { %1114 = vmatpush1.bf16.msra.mxu1 %v1113_v22  ;;  %v1145_v22 = vpack.c.bf16 %v590_v21, %v588_v20  ;;  %v732_v20 = vld [vmem:[#allocation2 + $0x720] sm:$0xff]  ;;  %v734_v21 = vld [vmem:[#allocation2 + $0x730] sm:$0xff] }
 0x118   :  { %1116 = vmatprep.subr.bf16.mxu1 %v1115_v23  ;;  %v697_v23 = vld [vmem:[#allocation2 + $0x608] sm:$0xff] }
 0x119   :  { %v1147_v26 = vpack.c.bf16 %v699_v24, %v697_v23  ;;  %v739_v23 = vld [vmem:[#allocation2 + $0x758] sm:$0xff]  ;;  %v1185_v24 = vpack.c.bf16 %v734_v21, %v732_v20 }
 0x11b   :  { %1118 = vmatpush1.bf16.msra.mxu1 %v1117_v28  ;;  %v701_v28 = vld [vmem:[#allocation2 + $0x628] sm:$0xff]  ;;  %1148 = vmatprep.subr.bf16.mxu0 %v1147_v26  ;;  %v736_v26 = vld [vmem:[#allocation2 + $0x740] sm:$0xff] }
 0x11c   :  { %1120 = vmatprep.subr.bf16.mxu1 %v1119_v29  ;;  %v703_v29 = vld [vmem:[#allocation2 + $0x638] sm:$0xff] }
 0x11d   :  { %v1151_v31 = vpack.c.bf16 %v703_v29, %v701_v28  ;;  %v741_v28 = vld [vmem:[#allocation2 + $0x768] sm:$0xff]  ;;  %v743_v29 = vld [vmem:[#allocation2 + $0x778] sm:$0xff] }
 0x11f   :  { %1122 = vmatpush1.bf16.msra.mxu1 %v1121_v34  ;;  %v705_v34 = vld [vmem:[#allocation2 + $0x648] sm:$0xff] }
 0x120   :  { %1124 = vmatprep.subr.bf16.mxu1 %v1123_v35  ;;  %v707_v35 = vld [vmem:[#allocation2 + $0x658] sm:$0xff] }
 0x121   :  { %v1155_v37 = vpack.c.bf16 %v707_v35, %v705_v34  ;;  %v745_v34 = vld [vmem:[#allocation2 + $0x788] sm:$0xff]  ;;  %v747_v35 = vld [vmem:[#allocation2 + $0x798] sm:$0xff] }
 0x123   :  { %1126 = vmatpush1.bf16.msra.mxu1 %v1125_v40  ;;  %v709_v40 = vld [vmem:[#allocation2 + $0x668] sm:$0xff] }
 0x124   :  { %1128 = vmatprep.subr.bf16.mxu1 %v1127_v41  ;;  %v711_v41 = vld [vmem:[#allocation2 + $0x678] sm:$0xff] }
 0x125   :  { %v1159_v43 = vpack.c.bf16 %v711_v41, %v709_v40  ;;  %v749_v40 = vld [vmem:[#allocation2 + $0x7a8] sm:$0xff]  ;;  %v751_v41 = vld [vmem:[#allocation2 + $0x7b8] sm:$0xff] }
 0x127   :  { %1130 = vmatpush1.bf16.msra.mxu1 %v1129_v46  ;;  %v713_v46 = vld [vmem:[#allocation2 + $0x688] sm:$0xff] }
 0x128   :  { %1132 = vmatprep.subr.bf16.mxu1 %v1131_v47  ;;  %v715_v47 = vld [vmem:[#allocation2 + $0x698] sm:$0xff] }
 0x129   :  { %v1163_v49 = vpack.c.bf16 %v715_v47, %v713_v46  ;;  %v1201_v46 = vpack.c.bf16 %v750_v45, %v748_v44  ;;  %v410_v47 = vld [vmem:[%s1449_s4] sm:$0x3] }
 0x12a   :  { %v846_v44 = vld [vmem:[%s1452_s7] sm:$0xff] }
 0x12b   :  { %1134 = vmatpush1.bf16.msra.mxu1 %v1133_v50  ;;  %v712_v50 = vld [vmem:[#allocation2 + $0x680] sm:$0xff] }
 0x12c   :  { %1136 = vmatprep.subr.bf16.mxu1 %v1135_v5 }
 0x12f   :  { %1138 = vmatpush1.bf16.msra.mxu1 %v1137_v8  ;;  %v729_v8 = vld [vmem:[#allocation2 + $0x708] sm:$0xff] }
 0x130   :  { %1140 = vmatprep.subr.bf16.mxu1 %v1139_v12  ;;  %v1179_v12 = vpack.c.bf16 %v731_v9, %v729_v8  ;;  %v1203_v8 = vpack.c.bf16 %v755_v7, %v753_v6  ;;  %v752_v9 = vld [vmem:[#allocation2 + $0x7c0] sm:$0xff] }
 0x133   :  { %1142 = vmatpush1.bf16.msra.mxu1 %v1141_v16  ;;  %v733_v16 = vld [vmem:[#allocation2 + $0x728] sm:$0xff] }
 0x134   :  { %1144 = vmatprep.subr.bf16.mxu1 %v1143_v19  ;;  %v1183_v19 = vpack.c.bf16 %v735_v17, %v733_v16  ;;  %v758_v16 = vld [vmem:[#allocation2 + $0x7f0] sm:$0xff] }
 0x135   :  { %v1209_v17 = vpack.c.bf16 %v758_v16, %v756_v15 }
 0x137   :  { %1146 = vmatpush1.bf16.msra.mxu1 %v1145_v22  ;;  %v737_v22 = vld [vmem:[#allocation2 + $0x748] sm:$0xff] }
 0x138   :  { %v1187_v25 = vpack.c.bf16 %v739_v23, %v737_v22 }
 0x1cd   :  { %v308_v56 = vpop.f32.mrb[0].mxu1 }
 0x1ce   :  { %v326_v58 = vmul.f32 %v319_v53, %v308_v56  ;;  %v310_v59 = vpop.f32.mrb[1].mxu1  ;;  %v719_v53 = vld [vmem:[#allocation2 + $0x6b8] sm:$0xff]  ;;  %v716_v56 = vld [vmem:[#allocation2 + $0x6a0] sm:$0xff] }
 0x1cf   :  { %v327_v60 = vmul.f32 %v323_v54, %v310_v59  ;;  %v1165_v54 = vpack.c.bf16 %v714_v51, %v712_v50  ;;  %v723_v59 = vld [vmem:[#allocation2 + $0x6d8] sm:$0xff]  ;;  %v419_v50 = vrot.slane %v410_v47, %v1362_v2 }
 0x1d0   :  { %v341_v61 = vadd.f32 %v334_v55, %v326_v58  ;;  %v1167_v55 = vpack.c.bf16 %v719_v53, %v717_v52  ;;  %v721_v58 = vld [vmem:[#allocation2 + $0x6c8] sm:$0xff]  ;;  %v947_v52 = vld [vmem:[%s1451_s6 + $0x4] sm:$0x3] }
 0x1d1   :  { %v342_v62 = vadd.f32 %v338_v57, %v327_v60  ;;  %v718_v57 = vld [vmem:[#allocation2 + $0x6b0] sm:$0xff] }
 0x1d2   :  { %v343_v1 = vmax.f32 %v341_v61, 0.0  ;;  %v1169_v60 = vpack.c.bf16 %v718_v57, %v716_v56  ;;  %v1171_v61 = vpack.c.bf16 %v723_v59, %v721_v58  ;;  %v516_v59 = vrot.slane %v947_v52, %v1357_v0 }
 0x1d3   :  { %v344_v63 = vmax.f32 %v342_v62, 0.0  ;;  %v720_v62 = vld [vmem:[#allocation2 + $0x6c0] sm:$0xff] }
 0x1d5   :  { %486 = vmatprep.mubr.f32.mxu0 %v344_v63  ;;  %v722_v63 = vld [vmem:[#allocation2 + $0x6d0] sm:$0xff] }
 0x1d6   :  { %487 = vmatmul.mubr.f32.vlgmr.msra.gmra.mrb[2].mxu0 %v343_v1  ;;  %v725_v1 = vld [vmem:[#allocation2 + $0x6e8] sm:$0xff]  ;;  %v1173_v4 = vpack.c.bf16 %v722_v63, %v720_v62 }
 0x1d7   :  { %1150 = vmatpush1.bf16.msra.mxu0 %v1149_v30  ;;  %v1175_v5 = vpack.c.bf16 %v727_v3, %v725_v1  ;;  %v1189_v30 = vpack.c.bf16 %v738_v27, %v736_v26 }
 0x1d8   :  { %1152 = vmatprep.subr.bf16.mxu0 %v1151_v31  ;;  %v1191_v31 = vpack.c.bf16 %v743_v29, %v741_v28 }
 0x1db   :  { %1154 = vmatpush1.bf16.msra.mxu0 %v1153_v36  ;;  %v1193_v36 = vpack.c.bf16 %v742_v33, %v740_v32  ;;  %v847_v32 = vld [vmem:[%s1452_s7 + $0x8] sm:$0xff]  ;;  %v848_v33 = vld [vmem:[%s1453_s8] sm:$0xff] }
 0x1dc   :  { %1156 = vmatprep.subr.bf16.mxu0 %v1155_v37  ;;  %v1195_v37 = vpack.c.bf16 %v747_v35, %v745_v34  ;;  %v1270_v34 = vmov 0   ;;  %v950_v35 = vld [vmem:[%s1449_s4 + $0x2] sm:$0x3]  ;;  %s932_s4 = sshll.u32 %s1271_s0, 4  ;;  %s933_s4 = int_to_ptr.vmem [resolvable:$true] %s932_s4 }
 0x1dd   :  { %1217 = vset.pattern.permute.xlu0 %v1270_v34  ;;  %s1240_s1 = scalar_lea.vmem %s933_s4, 128  ;;  %p1245_p9 = scmp.lt.s32.totalorder %s933_s4, %s933_s4 }
 0x1de   :  { %851 = vperm.xlu0 %1217, %v848_v33   ;;  %p1241_p8 = scmp.ne.s32.totalorder %s933_s4, %s1240_s1  ;;  %p1246_p10 = scmp.lt.s32.totalorder %s1240_s1, %s1240_s1 }
 0x1df   :  { %1158 = vmatpush1.bf16.msra.mxu0 %v1157_v42  ;;  %v1197_v42 = vpack.c.bf16 %v746_v39, %v744_v38 }
 0x1e0   :  { %1160 = vmatprep.subr.bf16.mxu0 %v1159_v43  ;;  %v1199_v43 = vpack.c.bf16 %v751_v41, %v749_v40  ;;  %p1247_p11 = por %p1246_p10, %p1245_p9 }
 0x1e2   :  { %p1248_p12 = pnand %p1247_p11, %p1241_p8 }
 0x1e3   :  { %1162 = vmatpush1.bf16.msra.mxu0 %v1161_v48  ;;  %v415_v48 = vrot.slane %v410_v47, %v1357_v0 }
 0x1e4   :  { %1164 = vmatprep.subr.bf16.mxu0 %v1163_v49  ;;  %v946_v49 = vld [vmem:[%s1450_s5 + $0x4] sm:$0x3] }
 0x1e5   :  { %v505_v57 = vrot.slane %v946_v49, %v1362_v2 }
 0x1e7   :  { %1166 = vmatpush1.bf16.msra.mxu0 %v1165_v54  ;;  %v501_v54 = vrot.slane %v946_v49, %v1357_v0 }
 0x1e8   :  { %1168 = vmatprep.subr.bf16.mxu0 %v1167_v55 }
 0x1eb   :  { %1170 = vmatpush1.bf16.msra.mxu0 %v1169_v60 }
 0x1ec   :  { %1172 = vmatprep.subr.bf16.mxu0 %v1171_v61  ;;  %v520_v61 = vrot.slane %v947_v52, %v1362_v2 }
 0x1ef   :  { %1174 = vmatpush1.bf16.msra.mxu0 %v1173_v4 }
 0x1f0   :  { %1176 = vmatprep.subr.bf16.mxu0 %v1175_v5 }
 0x1f3   :  { %1178 = vmatpush1.bf16.msra.mxu0 %v1177_v11  ;;  %v754_v11 = vld [vmem:[#allocation2 + $0x7d0] sm:$0xff] }
 0x1f4   :  { %1180 = vmatprep.subr.bf16.mxu0 %v1179_v12  ;;  %v757_v12 = vld [vmem:[#allocation2 + $0x7e8] sm:$0xff] }
 0x1f7   :  { %1182 = vmatpush1.bf16.msra.mxu0 %v1181_v18  ;;  %v948_v18 = vld [vmem:[%s1450_s5 + $0x6] sm:$0x3] }
 0x1f8   :  { %1184 = vmatprep.subr.bf16.mxu0 %v1183_v19  ;;  %v949_v19 = vld [vmem:[%s1451_s6 + $0x6] sm:$0x3]  ;;  %v669_v20 = vrot.slane %v948_v18, %v1357_v0  ;;  %v673_v21 = vrot.slane %v948_v18, %v1362_v2 }
 0x1f9   :  { %v684_v22 = vrot.slane %v949_v19, %v1357_v0 }
 0x1fb   :  { %1186 = vmatpush1.bf16.msra.mxu0 %v1185_v24  ;;  %v688_v24 = vrot.slane %v949_v19, %v1362_v2 }
 0x1fc   :  { %1188 = vmatprep.subr.bf16.mxu0 %v1187_v25 }
 0x1ff   :  { %1190 = vmatpush1.bf16.msra.mxu0 %v1189_v30 }
 0x200   :  { %1192 = vmatprep.subr.bf16.mxu0 %v1191_v31 }
 0x203   :  { %1194 = vmatpush1.bf16.msra.mxu0 %v1193_v36  ;;  %v766_v36 = vrot.slane %v950_v35, %v1357_v0 }
 0x204   :  { %1196 = vmatprep.subr.bf16.mxu0 %v1195_v37  ;;  %v770_v37 = vrot.slane %v950_v35, %v1362_v2 }
 0x207   :  { %1198 = vmatpush1.bf16.msra.mxu0 %v1197_v42 }
 0x208   :  { %1200 = vmatprep.subr.bf16.mxu0 %v1199_v43 }
 0x20b   :  { %1202 = vmatpush1.bf16.msra.mxu0 %v1201_v46 }
 0x20c   :  { %1204 = vmatprep.subr.bf16.mxu0 %v1203_v8 }
 0x25d   :  { %v852_v45 = vpop.permute.xlu0 %851 }
 0x2a9   :  { %v488_v51 = vpop.f32.mrb[2].mxu0 }
 0x2aa   :  { %v489_v53 = vadd.f32 %v488_v51, %v415_v48  ;;  %v490_v55 = vpop.f32.mrb[3].mxu0 }
 0x2ab   :  { %v491_v56 = vadd.f32 %v490_v55, %v419_v50 }
 0x2ac   :  { %v493_v58 = vadd.f32 %v489_v53, %v1374_v10  ;;  %v1205_v10 = vpack.c.bf16 %v754_v11, %v752_v9 }
 0x2ad   :  { %v494_v60 = vadd.f32 %v491_v56, %v1377_v13  ;;  %v759_v13 = vld [vmem:[#allocation2 + $0x7f8] sm:$0xff] }
 0x2ae   :  { %v508_v62 = vmul.f32 %v501_v54, %v493_v58  ;;  %1206 = vmatpush1.bf16.msra.mxu0 %v1205_v10  ;;  %v1207_v14 = vpack.c.bf16 %v759_v13, %v757_v12 }
 0x2af   :  { %v509_v63 = vmul.f32 %v505_v57, %v494_v60 }
 0x2b0   :  { %v523_v1 = vadd.f32 %v516_v59, %v508_v62  ;;  %1208 = vmatprep.subr.bf16.mxu0 %v1207_v14 }
 0x2b1   :  { %v524_v3 = vadd.f32 %v520_v61, %v509_v63 }
 0x2b2   :  { %v525_v5 = vmax.f32 %v523_v1, 0.0  ;;  %1210 = vmatpush1.bf16.msra.mxu0 %v1209_v17 }
 0x2b3   :  { %v526_v4 = vmax.f32 %v524_v3, 0.0 }
 0x2b5   :  { %656 = vmatprep.mubr.f32.mxu1 %v526_v4 }
 0x2b6   :  { %657 = vmatmul.mubr.f32.vlgmr.msra.gmra.mrb[2].mxu1 %v525_v5 }
 0x2b7   :  { %918 = vmatprep.mubr.f32.mxu1 %v847_v32 }
 0x389   :  { %v658_v23 = vpop.f32.mrb[2].mxu1 }
 0x38a   :  { %v676_v25 = vmul.f32 %v669_v20, %v658_v23  ;;  %v660_v26 = vpop.f32.mrb[3].mxu1 }
 0x38b   :  { %v677_v27 = vmul.f32 %v673_v21, %v660_v26 }
 0x38c   :  { %v691_v28 = vadd.f32 %v684_v22, %v676_v25 }
 0x38d   :  { %v692_v29 = vadd.f32 %v688_v24, %v677_v27 }
 0x38e   :  { %v693_v31 = vmax.f32 %v691_v28, 0.0 }
 0x38f   :  { %v694_v30 = vmax.f32 %v692_v29, 0.0 }
 0x391   :  { %837 = vmatprep.mubr.f32.mxu0 %v694_v30 }
 0x392   :  { %838 = vmatmul.mubr.f32.vlgmr.msra.gmra.mrb[4].mxu0 %v693_v31 }
 0x465   :  { %v839_v38 = vpop.f32.mrb[4].mxu0 }
 0x466   :  { %v840_v39 = vadd.f32 %v839_v38, %v766_v36  ;;  %v841_v40 = vpop.f32.mrb[5].mxu0 }
 0x467   :  { %v842_v41 = vadd.f32 %v841_v40, %v770_v37 }
 0x468   :  { %v844_v43 = vadd.f32 %v840_v39, %v493_v58 }
 0x469   :  { %v845_v42 = vadd.f32 %v842_v41, %v494_v60 }
 0x46b   :  { %854 = vmatprep.subr.mxu1 %v845_v42 }
 0x46c   :  { %855 = vmatpush1.xpose.msra.mxu1 %v844_v43 }
 0x46f   :  { %919 = vmatmul.mubr.f32.vlgmr.msra.gmra.mrb[4].mxu1 %v846_v44 }
 0x542   :  { %v920_v46 = vpop.f32.mrb[4].mxu1 }
 0x543   :  { %v921_v0 = vadd.f32 %v920_v46, %v852_v45  ;;  %v922_v2 = vpop.f32.mrb[5].mxu1 }
 0x545   :  { %925 = vst.msk [vmem:[#allocation5] sm:$0xff] %vm924_vm2, %v921_v0 }
 0x546   :  { %1251 = shalt.err (!%p1248_p12)
}
 0x547   :  { %s1252_s7 = scalar_lea.hbm %s1454_s9, 128 }
 0x548   :  { %p1253_p13 = scmp.ne.s32.totalorder %s1454_s9, %s1252_s7  ;;  %p1256_p0 = scmp.lt.u32.totalorder %s1252_s7, %s1454_s9 }
 0x54a   :  { %p1258_p1 = pnand %p1256_p0, %p1253_p13 }
 0x54c   :  { %1261 = shalt.err (!%p1258_p1)
}
 0x54d   :  { %935 = dma.vmem_to_hbm [thread:$0]  %s933_s4, 128, %s1454_s9, [#allocation4]  }
 0x54e   :  { %1264 = dma.done.wait [#allocation4], 128  }
 0x54f   :  { %1265 = vsyncadd [#allocation4], 4294967168 }
 0x550   :  { %939 = vsyncpa [#allocation3], 1 }
 0x551   :  { %940 = vsyncpa [#allocation4], 1 }

</bundles_post_ra>
